<compile_context>
chip_gen: v7x
topology: tpu7x:2x2x1
jax: 0.10.0
libtpu: 0.0.40
codegen_flags: <defaults>
</compile_context>

<pallas_src>
import functools

import numpy as np

import jax
import jax.numpy as jnp
from jax import lax
from jax.experimental import pallas as pl
from jax.experimental.pallas import tpu as pltpu


# -----------------------------------------------------------------------------
# Fused kernel
# -----------------------------------------------------------------------------
def _disc_kernel(tb, x_ref, w1_ref, b1_ref, w2_ref, b2_ref,
                 f1_ref, bf1_ref, w3_ref, bf2_ref, o_ref):
    f32 = jnp.float32
    bf16 = jnp.bfloat16

    x = x_ref[...]                                            # (28*tb, 28) bf16

    # conv1 (1->10, k=5) with the column half of the 2x2 max-pool folded into
    # the weights: even pooled columns at lanes [0,120), odd at [128,248).
    y1 = jnp.dot(x[0:24 * tb, :], w1_ref[0], preferred_element_type=f32)
    for kh in range(1, 5):
        y1 = y1 + jnp.dot(x[kh * tb:(kh + 24) * tb, :], w1_ref[kh],
                          preferred_element_type=f32)         # (24*tb, 256)
    mh1 = jnp.maximum(y1[:, 0:128], y1[:, 128:256])           # column pool
    m1 = mh1.reshape(12, 2 * tb, 128)                         # row pool (tile-aligned)
    mv1 = jnp.maximum(m1[:, :tb, :], m1[:, tb:, :]).reshape(12 * tb, 128)
    a1 = jnp.maximum(mv1 + b1_ref[...], 0.0)                  # bias + relu (f32)
    a1b = a1.astype(bf16)

    # conv2 (10->20, k=5); conv2_drop is identity in eval mode.
    y2 = jnp.dot(a1b[0:8 * tb, :], w2_ref[0], preferred_element_type=f32)
    for kh in range(1, 5):
        y2 = y2 + jnp.dot(a1b[kh * tb:(kh + 8) * tb, :], w2_ref[kh],
                          preferred_element_type=f32)         # (8*tb, 256)
    mh2 = jnp.maximum(y2[:, 0:128], y2[:, 128:256])
    m2 = mh2.reshape(4, 2 * tb, 128)
    mv2 = jnp.maximum(m2[:, :tb, :], m2[:, tb:, :]).reshape(4 * tb, 128)
    a2 = jnp.maximum(mv2 + b2_ref[...], 0.0)                   # (4*tb, 128)
    a2b = a2.astype(bf16)

    # fc1 + relu: channel-major x.view(-1, 320) is folded into F1 (padded to
    # 128 output lanes; the pad stays exactly 0 through relu).
    h = jnp.dot(a2b[0:tb, :], f1_ref[0], preferred_element_type=f32)
    for hh in range(1, 4):
        h = h + jnp.dot(a2b[hh * tb:(hh + 1) * tb, :], f1_ref[hh],
                        preferred_element_type=f32)           # (tb, 128)
    h = jnp.maximum(h + bf1_ref[...], 0.0)
    # TODO(synk): training-mode dropout (F.dropout / conv2_drop) not implemented;
    # inference (eval) semantics only, where both dropouts are identity.

    # fc2 + sigmoid, lane-dense (1, tb) output.
    z = jnp.dot(w3_ref[...], h.T, preferred_element_type=f32) + bf2_ref[...]
    o_ref[...] = 1.0 / (1.0 + jnp.exp(-z))


# -----------------------------------------------------------------------------
# Host-side constant construction (numpy, once per weight set)
# -----------------------------------------------------------------------------
def build_constants(params):
    w1, b1, w2, b2, wf1, bf1, wf2, bf2 = [np.asarray(p, np.float32) for p in params]

    # conv1 Toeplitz with the column pool folded in.
    W1 = np.zeros((5, 28, 256), np.float32)
    for kh in range(5):
        for kw in range(5):
            for jp in range(12):
                W1[kh, 2 * jp + kw, jp * 10:jp * 10 + 10] = w1[:, 0, kh, kw]
                W1[kh, 2 * jp + 1 + kw, 128 + jp * 10:128 + jp * 10 + 10] = w1[:, 0, kh, kw]
    b1row = np.zeros((1, 128), np.float32)
    b1row[0, :120] = np.tile(b1, 12)

    # conv2 Toeplitz (input lanes = jp*10 + ci, jp in 0..11) with column pool folded.
    W2 = np.zeros((5, 128, 256), np.float32)
    for kh in range(5):
        for kw in range(5):
            w_t = w2[:, :, kh, kw].T                          # (ci, co)
            for jp in range(4):
                re = (2 * jp + kw) * 10
                ro = (2 * jp + 1 + kw) * 10
                W2[kh, re:re + 10, jp * 20:jp * 20 + 20] = w_t
                W2[kh, ro:ro + 10, 128 + jp * 20:128 + jp * 20 + 20] = w_t
    b2row = np.zeros((1, 128), np.float32)
    b2row[0, :80] = np.tile(b2, 4)

    # fc1 folded per pooled row hh, matching x.view(-1, 320)'s (C, H, W) order.
    F1 = np.zeros((4, 128, 128), np.float32)
    wf1_r = wf1.reshape(50, 20, 4, 4)                         # (n, co, hh, ww)
    for hh in range(4):
        for ww in range(4):
            for co in range(20):
                F1[hh, ww * 20 + co, :50] = wf1_r[:, co, hh, ww]
    bf1row = np.zeros((1, 128), np.float32)
    bf1row[0, :50] = bf1

    W3 = np.zeros((1, 128), np.float32)
    W3[0, :50] = wf2[0]
    bf2v = np.asarray(bf2, np.float32).reshape(1, 1)

    return (jnp.asarray(W1, jnp.bfloat16), jnp.asarray(b1row),
            jnp.asarray(W2, jnp.bfloat16), jnp.asarray(b2row),
            jnp.asarray(F1, jnp.bfloat16), jnp.asarray(bf1row),
            jnp.asarray(W3), jnp.asarray(bf2v))


def _pick_tb(n, tb_max):
    tb = min(tb_max, 16 * pl.cdiv(n, 16))          # multiple of 16 (bf16 sublanes)
    if n > tb_max:                                  # keep >= 2 grid steps (v7x megacore)
        tb = min(tb, 16 * pl.cdiv(pl.cdiv(n, 2), 16))
    return max(tb, 16)


# -----------------------------------------------------------------------------
# Forward (inference; dropouts are identity)
# -----------------------------------------------------------------------------
def _forward_impl(x_nchw, consts, tb_max):
    n = x_nchw.shape[0]
    tb = _pick_tb(n, tb_max)
    nb = pl.cdiv(n, tb)

    # (N,1,28,28) -> (nb, 28*tb, 28): rows ordered (h, image) inside each tile.
    x = x_nchw[:, 0].astype(jnp.bfloat16)
    x = jnp.pad(x, ((0, nb * tb - n), (0, 0), (0, 0)))
    xb = x.reshape(nb, tb, 28, 28).transpose(0, 2, 1, 3).reshape(nb, 28 * tb, 28)

    def const_spec(a):
        zeros = (0,) * a.ndim
        return pl.BlockSpec(a.shape, lambda t, _z=zeros: _z)

    out = pl.pallas_call(
        functools.partial(_disc_kernel, tb),
        out_shape=jax.ShapeDtypeStruct((nb, 1, tb), jnp.float32),
        grid=(nb,),
        in_specs=[pl.BlockSpec((None, 28 * tb, 28), lambda t: (t, 0, 0))]
                 + [const_spec(a) for a in consts],
        out_specs=pl.BlockSpec((None, 1, tb), lambda t: (t, 0, 0)),
        compiler_params=pltpu.CompilerParams(
            dimension_semantics=("parallel",),
            vmem_limit_bytes=32 * 1024 * 1024),
    )(xb, *consts)

    return out.reshape(nb * tb)[:n].reshape(n, 1)


def make_discriminator(params, tb_max=128):
    """Build the folded constants once per weight set and return a jitted forward."""
    consts = build_constants(params)
    fwd = jax.jit(functools.partial(_forward_impl, tb_max=tb_max))
    return lambda x: fwd(x, consts)


# -----------------------------------------------------------------------------
# Pure-JAX reference (PyTorch semantics, f32) for verification
# -----------------------------------------------------------------------------
def reference_forward(x, params):
    w1, b1, w2, b2, wf1, bf1, wf2, bf2 = params
    dn = ("NCHW", "OIHW", "NCHW")
    y = lax.conv_general_dilated(x, w1, (1, 1), "VALID", dimension_numbers=dn)
    y = y + b1[None, :, None, None]
    y = lax.reduce_window(y, -jnp.inf, lax.max, (1, 1, 2, 2), (1, 1, 2, 2), "VALID")
    y = jnp.maximum(y, 0.0)
    y = lax.conv_general_dilated(y, w2, (1, 1), "VALID", dimension_numbers=dn)
    y = y + b2[None, :, None, None]
    y = lax.reduce_window(y, -jnp.inf, lax.max, (1, 1, 2, 2), (1, 1, 2, 2), "VALID")
    y = jnp.maximum(y, 0.0)
    y = y.reshape(-1, 320)
    y = jnp.maximum(y @ wf1.T + bf1, 0.0)
    y = y @ wf2.T + bf2
    return 1.0 / (1.0 + jnp.exp(-y))


def init_params(key):
    ks = jax.random.split(key, 8)
    w1 = 0.1 * jax.random.normal(ks[0], (10, 1, 5, 5), jnp.float32)
    b1 = 0.1 * jax.random.normal(ks[1], (10,), jnp.float32)
    w2 = 0.1 * jax.random.normal(ks[2], (20, 10, 5, 5), jnp.float32)
    b2 = 0.1 * jax.random.normal(ks[3], (20,), jnp.float32)
    wf1 = 0.05 * jax.random.normal(ks[4], (50, 320), jnp.float32)
    bf1 = 0.05 * jax.random.normal(ks[5], (50,), jnp.float32)
    wf2 = 0.05 * jax.random.normal(ks[6], (1, 50), jnp.float32)
    bf2 = 0.05 * jax.random.normal(ks[7], (1,), jnp.float32)
    return (w1, b1, w2, b2, wf1, bf1, wf2, bf2)


if __name__ == "__main__":
    key = jax.random.PRNGKey(0)
    kx, kp = jax.random.split(key)
    params = init_params(kp)
    forward = make_discriminator(params)

    # 28x28 input is implied by the module (fc1 expects 320 = 20*4*4 features).
    x = jax.random.normal(kx, (2, 1, 28, 28), jnp.float32)
    out = jax.block_until_ready(forward(x))
    ref = reference_forward(x, params)
    assert out.shape == (2, 1), out.shape
    # Tolerance accounts for intentional bf16 matmul operands (f32 accumulation).
    assert jnp.allclose(out, ref, rtol=3e-2, atol=3e-2), (out, ref)

    # Also exercise a multi-step grid (2 batch tiles + ragged padding).
    x2 = jax.random.normal(jax.random.PRNGKey(1), (150, 1, 28, 28), jnp.float32)
    out2 = jax.block_until_ready(forward(x2))
    ref2 = reference_forward(x2, params)
    assert out2.shape == (150, 1), out2.shape
    assert jnp.allclose(out2, ref2, rtol=3e-2, atol=3e-2), \
        float(jnp.max(jnp.abs(out2 - ref2)))

    print("KERNEL_OK")
</pallas_src>

<mosaic_0001>
module attributes {stable_mosaic.version = 11 : i64} {
  func.func @_disc_kernel(%arg0: i32, %arg1: memref<1x448x28xbf16, #tpu.memory_space<vmem>>, %arg2: memref<5x28x256xbf16, #tpu.memory_space<vmem>>, %arg3: memref<1x128xf32, #tpu.memory_space<vmem>>, %arg4: memref<5x128x256xbf16, #tpu.memory_space<vmem>>, %arg5: memref<1x128xf32, #tpu.memory_space<vmem>>, %arg6: memref<4x128x128xbf16, #tpu.memory_space<vmem>>, %arg7: memref<1x128xf32, #tpu.memory_space<vmem>>, %arg8: memref<1x128xf32, #tpu.memory_space<vmem>>, %arg9: memref<1x1xf32, #tpu.memory_space<vmem>>, %arg10: memref<1x1x16xf32, #tpu.memory_space<vmem>>) attributes {dimension_semantics = [#tpu.dimension_semantics<parallel>], iteration_bounds = array<i64: 1>, scalar_prefetch = 0 : i64, scratch_operands = 0 : i64, tpu.core_type = #tpu.core_type<tc>, window_params = [{transform_indices = @transform_0, window_bounds = array<i64: 1, 448, 28>}, {pipeline_mode = #tpu.pipeline_mode<synchronous>, transform_indices = @transform_1, window_bounds = array<i64: 5, 28, 256>}, {pipeline_mode = #tpu.pipeline_mode<synchronous>, transform_indices = @transform_2, window_bounds = array<i64: 1, 128>}, {pipeline_mode = #tpu.pipeline_mode<synchronous>, transform_indices = @transform_3, window_bounds = array<i64: 5, 128, 256>}, {pipeline_mode = #tpu.pipeline_mode<synchronous>, transform_indices = @transform_4, window_bounds = array<i64: 1, 128>}, {pipeline_mode = #tpu.pipeline_mode<synchronous>, transform_indices = @transform_5, window_bounds = array<i64: 4, 128, 128>}, {pipeline_mode = #tpu.pipeline_mode<synchronous>, transform_indices = @transform_6, window_bounds = array<i64: 1, 128>}, {pipeline_mode = #tpu.pipeline_mode<synchronous>, transform_indices = @transform_7, window_bounds = array<i64: 1, 128>}, {pipeline_mode = #tpu.pipeline_mode<synchronous>, transform_indices = @transform_8, window_bounds = array<i64: 1, 1>}, {transform_indices = @transform_9, window_bounds = array<i64: 1, 1, 16>}]} {
    %c0 = arith.constant 0 : index
    %c0_0 = arith.constant 0 : index
    %c0_1 = arith.constant 0 : index
    %0 = vector.load %arg1[%c0, %c0_0, %c0_1] : memref<1x448x28xbf16, #tpu.memory_space<vmem>>, vector<1x448x28xbf16>
    %1 = vector.shape_cast %0 : vector<1x448x28xbf16> to vector<448x28xbf16>
    %2 = vector.extract_strided_slice %1 {offsets = [0, 0], sizes = [384, 28], strides = [1, 1]} : vector<448x28xbf16> to vector<384x28xbf16>
    %c0_2 = arith.constant 0 : index
    %c0_3 = arith.constant 0 : index
    %c0_4 = arith.constant 0 : index
    %3 = vector.load %arg2[%c0_2, %c0_3, %c0_4] : memref<5x28x256xbf16, #tpu.memory_space<vmem>>, vector<1x28x256xbf16>
    %4 = vector.shape_cast %3 : vector<1x28x256xbf16> to vector<28x256xbf16>
    %cst = arith.constant dense<0.000000e+00> : vector<384x256xf32>
    %5 = tpu.matmul %2, %4, %cst {dimension_numbers = #tpu.dot_dimension_numbers<[1], [0], [0], [1], [0, 0, 1, 1], [], []>} : vector<384x28xbf16>, vector<28x256xbf16>, vector<384x256xf32> -> vector<384x256xf32>
    %6 = vector.extract_strided_slice %1 {offsets = [16, 0], sizes = [384, 28], strides = [1, 1]} : vector<448x28xbf16> to vector<384x28xbf16>
    %c1 = arith.constant 1 : index
    %c0_5 = arith.constant 0 : index
    %c0_6 = arith.constant 0 : index
    %7 = vector.load %arg2[%c1, %c0_5, %c0_6] : memref<5x28x256xbf16, #tpu.memory_space<vmem>>, vector<1x28x256xbf16>
    %8 = vector.shape_cast %7 : vector<1x28x256xbf16> to vector<28x256xbf16>
    %cst_7 = arith.constant dense<0.000000e+00> : vector<384x256xf32>
    %9 = tpu.matmul %6, %8, %cst_7 {dimension_numbers = #tpu.dot_dimension_numbers<[1], [0], [0], [1], [0, 0, 1, 1], [], []>} : vector<384x28xbf16>, vector<28x256xbf16>, vector<384x256xf32> -> vector<384x256xf32>
    %10 = arith.addf %5, %9 : vector<384x256xf32>
    %11 = vector.extract_strided_slice %1 {offsets = [32, 0], sizes = [384, 28], strides = [1, 1]} : vector<448x28xbf16> to vector<384x28xbf16>
    %c2 = arith.constant 2 : index
    %c0_8 = arith.constant 0 : index
    %c0_9 = arith.constant 0 : index
    %12 = vector.load %arg2[%c2, %c0_8, %c0_9] : memref<5x28x256xbf16, #tpu.memory_space<vmem>>, vector<1x28x256xbf16>
    %13 = vector.shape_cast %12 : vector<1x28x256xbf16> to vector<28x256xbf16>
    %cst_10 = arith.constant dense<0.000000e+00> : vector<384x256xf32>
    %14 = tpu.matmul %11, %13, %cst_10 {dimension_numbers = #tpu.dot_dimension_numbers<[1], [0], [0], [1], [0, 0, 1, 1], [], []>} : vector<384x28xbf16>, vector<28x256xbf16>, vector<384x256xf32> -> vector<384x256xf32>
    %15 = arith.addf %10, %14 : vector<384x256xf32>
    %16 = vector.extract_strided_slice %1 {offsets = [48, 0], sizes = [384, 28], strides = [1, 1]} : vector<448x28xbf16> to vector<384x28xbf16>
    %c3 = arith.constant 3 : index
    %c0_11 = arith.constant 0 : index
    %c0_12 = arith.constant 0 : index
    %17 = vector.load %arg2[%c3, %c0_11, %c0_12] : memref<5x28x256xbf16, #tpu.memory_space<vmem>>, vector<1x28x256xbf16>
    %18 = vector.shape_cast %17 : vector<1x28x256xbf16> to vector<28x256xbf16>
    %cst_13 = arith.constant dense<0.000000e+00> : vector<384x256xf32>
    %19 = tpu.matmul %16, %18, %cst_13 {dimension_numbers = #tpu.dot_dimension_numbers<[1], [0], [0], [1], [0, 0, 1, 1], [], []>} : vector<384x28xbf16>, vector<28x256xbf16>, vector<384x256xf32> -> vector<384x256xf32>
    %20 = arith.addf %15, %19 : vector<384x256xf32>
    %21 = vector.extract_strided_slice %1 {offsets = [64, 0], sizes = [384, 28], strides = [1, 1]} : vector<448x28xbf16> to vector<384x28xbf16>
    %c4 = arith.constant 4 : index
    %c0_14 = arith.constant 0 : index
    %c0_15 = arith.constant 0 : index
    %22 = vector.load %arg2[%c4, %c0_14, %c0_15] : memref<5x28x256xbf16, #tpu.memory_space<vmem>>, vector<1x28x256xbf16>
    %23 = vector.shape_cast %22 : vector<1x28x256xbf16> to vector<28x256xbf16>
    %cst_16 = arith.constant dense<0.000000e+00> : vector<384x256xf32>
    %24 = tpu.matmul %21, %23, %cst_16 {dimension_numbers = #tpu.dot_dimension_numbers<[1], [0], [0], [1], [0, 0, 1, 1], [], []>} : vector<384x28xbf16>, vector<28x256xbf16>, vector<384x256xf32> -> vector<384x256xf32>
    %25 = arith.addf %20, %24 : vector<384x256xf32>
    %26 = vector.extract_strided_slice %25 {offsets = [0, 0], sizes = [384, 128], strides = [1, 1]} : vector<384x256xf32> to vector<384x128xf32>
    %27 = vector.extract_strided_slice %25 {offsets = [0, 128], sizes = [384, 128], strides = [1, 1]} : vector<384x256xf32> to vector<384x128xf32>
    %28 = arith.maximumf %26, %27 : vector<384x128xf32>
    %29 = vector.shape_cast %28 : vector<384x128xf32> to vector<12x32x128xf32>
    %30 = vector.extract_strided_slice %29 {offsets = [0, 0, 0], sizes = [12, 16, 128], strides = [1, 1, 1]} : vector<12x32x128xf32> to vector<12x16x128xf32>
    %31 = vector.extract_strided_slice %29 {offsets = [0, 16, 0], sizes = [12, 16, 128], strides = [1, 1, 1]} : vector<12x32x128xf32> to vector<12x16x128xf32>
    %32 = arith.maximumf %30, %31 : vector<12x16x128xf32>
    %33 = vector.shape_cast %32 : vector<12x16x128xf32> to vector<192x128xf32>
    %c0_17 = arith.constant 0 : index
    %c0_18 = arith.constant 0 : index
    %34 = vector.load %arg3[%c0_17, %c0_18] : memref<1x128xf32, #tpu.memory_space<vmem>>, vector<1x128xf32>
    %35 = vector.broadcast %34 : vector<1x128xf32> to vector<192x128xf32>
    %36 = arith.addf %33, %35 : vector<192x128xf32>
    %cst_19 = arith.constant 0.000000e+00 : f32
    %37 = vector.broadcast %cst_19 : f32 to vector<192x128xf32>
    %38 = arith.maximumf %36, %37 : vector<192x128xf32>
    %39 = arith.truncf %38 : vector<192x128xf32> to vector<192x128xbf16>
    %40 = vector.extract_strided_slice %39 {offsets = [0, 0], sizes = [128, 128], strides = [1, 1]} : vector<192x128xbf16> to vector<128x128xbf16>
    %c0_20 = arith.constant 0 : index
    %c0_21 = arith.constant 0 : index
    %c0_22 = arith.constant 0 : index
    %41 = vector.load %arg4[%c0_20, %c0_21, %c0_22] : memref<5x128x256xbf16, #tpu.memory_space<vmem>>, vector<1x128x256xbf16>
    %42 = vector.shape_cast %41 : vector<1x128x256xbf16> to vector<128x256xbf16>
    %cst_23 = arith.constant dense<0.000000e+00> : vector<128x256xf32>
    %43 = tpu.matmul %40, %42, %cst_23 {dimension_numbers = #tpu.dot_dimension_numbers<[1], [0], [0], [1], [0, 0, 1, 1], [], []>} : vector<128x128xbf16>, vector<128x256xbf16>, vector<128x256xf32> -> vector<128x256xf32>
    %44 = vector.extract_strided_slice %39 {offsets = [16, 0], sizes = [128, 128], strides = [1, 1]} : vector<192x128xbf16> to vector<128x128xbf16>
    %c1_24 = arith.constant 1 : index
    %c0_25 = arith.constant 0 : index
    %c0_26 = arith.constant 0 : index
    %45 = vector.load %arg4[%c1_24, %c0_25, %c0_26] : memref<5x128x256xbf16, #tpu.memory_space<vmem>>, vector<1x128x256xbf16>
    %46 = vector.shape_cast %45 : vector<1x128x256xbf16> to vector<128x256xbf16>
    %cst_27 = arith.constant dense<0.000000e+00> : vector<128x256xf32>
    %47 = tpu.matmul %44, %46, %cst_27 {dimension_numbers = #tpu.dot_dimension_numbers<[1], [0], [0], [1], [0, 0, 1, 1], [], []>} : vector<128x128xbf16>, vector<128x256xbf16>, vector<128x256xf32> -> vector<128x256xf32>
    %48 = arith.addf %43, %47 : vector<128x256xf32>
    %49 = vector.extract_strided_slice %39 {offsets = [32, 0], sizes = [128, 128], strides = [1, 1]} : vector<192x128xbf16> to vector<128x128xbf16>
    %c2_28 = arith.constant 2 : index
    %c0_29 = arith.constant 0 : index
    %c0_30 = arith.constant 0 : index
    %50 = vector.load %arg4[%c2_28, %c0_29, %c0_30] : memref<5x128x256xbf16, #tpu.memory_space<vmem>>, vector<1x128x256xbf16>
    %51 = vector.shape_cast %50 : vector<1x128x256xbf16> to vector<128x256xbf16>
    %cst_31 = arith.constant dense<0.000000e+00> : vector<128x256xf32>
    %52 = tpu.matmul %49, %51, %cst_31 {dimension_numbers = #tpu.dot_dimension_numbers<[1], [0], [0], [1], [0, 0, 1, 1], [], []>} : vector<128x128xbf16>, vector<128x256xbf16>, vector<128x256xf32> -> vector<128x256xf32>
    %53 = arith.addf %48, %52 : vector<128x256xf32>
    %54 = vector.extract_strided_slice %39 {offsets = [48, 0], sizes = [128, 128], strides = [1, 1]} : vector<192x128xbf16> to vector<128x128xbf16>
    %c3_32 = arith.constant 3 : index
    %c0_33 = arith.constant 0 : index
    %c0_34 = arith.constant 0 : index
    %55 = vector.load %arg4[%c3_32, %c0_33, %c0_34] : memref<5x128x256xbf16, #tpu.memory_space<vmem>>, vector<1x128x256xbf16>
    %56 = vector.shape_cast %55 : vector<1x128x256xbf16> to vector<128x256xbf16>
    %cst_35 = arith.constant dense<0.000000e+00> : vector<128x256xf32>
    %57 = tpu.matmul %54, %56, %cst_35 {dimension_numbers = #tpu.dot_dimension_numbers<[1], [0], [0], [1], [0, 0, 1, 1], [], []>} : vector<128x128xbf16>, vector<128x256xbf16>, vector<128x256xf32> -> vector<128x256xf32>
    %58 = arith.addf %53, %57 : vector<128x256xf32>
    %59 = vector.extract_strided_slice %39 {offsets = [64, 0], sizes = [128, 128], strides = [1, 1]} : vector<192x128xbf16> to vector<128x128xbf16>
    %c4_36 = arith.constant 4 : index
    %c0_37 = arith.constant 0 : index
    %c0_38 = arith.constant 0 : index
    %60 = vector.load %arg4[%c4_36, %c0_37, %c0_38] : memref<5x128x256xbf16, #tpu.memory_space<vmem>>, vector<1x128x256xbf16>
    %61 = vector.shape_cast %60 : vector<1x128x256xbf16> to vector<128x256xbf16>
    %cst_39 = arith.constant dense<0.000000e+00> : vector<128x256xf32>
    %62 = tpu.matmul %59, %61, %cst_39 {dimension_numbers = #tpu.dot_dimension_numbers<[1], [0], [0], [1], [0, 0, 1, 1], [], []>} : vector<128x128xbf16>, vector<128x256xbf16>, vector<128x256xf32> -> vector<128x256xf32>
    %63 = arith.addf %58, %62 : vector<128x256xf32>
    %64 = vector.extract_strided_slice %63 {offsets = [0, 0], sizes = [128, 128], strides = [1, 1]} : vector<128x256xf32> to vector<128x128xf32>
    %65 = vector.extract_strided_slice %63 {offsets = [0, 128], sizes = [128, 128], strides = [1, 1]} : vector<128x256xf32> to vector<128x128xf32>
    %66 = arith.maximumf %64, %65 : vector<128x128xf32>
    %67 = vector.shape_cast %66 : vector<128x128xf32> to vector<4x32x128xf32>
    %68 = vector.extract_strided_slice %67 {offsets = [0, 0, 0], sizes = [4, 16, 128], strides = [1, 1, 1]} : vector<4x32x128xf32> to vector<4x16x128xf32>
    %69 = vector.extract_strided_slice %67 {offsets = [0, 16, 0], sizes = [4, 16, 128], strides = [1, 1, 1]} : vector<4x32x128xf32> to vector<4x16x128xf32>
    %70 = arith.maximumf %68, %69 : vector<4x16x128xf32>
    %71 = vector.shape_cast %70 : vector<4x16x128xf32> to vector<64x128xf32>
    %c0_40 = arith.constant 0 : index
    %c0_41 = arith.constant 0 : index
    %72 = vector.load %arg5[%c0_40, %c0_41] : memref<1x128xf32, #tpu.memory_space<vmem>>, vector<1x128xf32>
    %73 = vector.broadcast %72 : vector<1x128xf32> to vector<64x128xf32>
    %74 = arith.addf %71, %73 : vector<64x128xf32>
    %cst_42 = arith.constant 0.000000e+00 : f32
    %75 = vector.broadcast %cst_42 : f32 to vector<64x128xf32>
    %76 = arith.maximumf %74, %75 : vector<64x128xf32>
    %77 = arith.truncf %76 : vector<64x128xf32> to vector<64x128xbf16>
    %78 = vector.extract_strided_slice %77 {offsets = [0, 0], sizes = [16, 128], strides = [1, 1]} : vector<64x128xbf16> to vector<16x128xbf16>
    %c0_43 = arith.constant 0 : index
    %c0_44 = arith.constant 0 : index
    %c0_45 = arith.constant 0 : index
    %79 = vector.load %arg6[%c0_43, %c0_44, %c0_45] : memref<4x128x128xbf16, #tpu.memory_space<vmem>>, vector<1x128x128xbf16>
    %80 = vector.shape_cast %79 : vector<1x128x128xbf16> to vector<128x128xbf16>
    %cst_46 = arith.constant dense<0.000000e+00> : vector<16x128xf32>
    %81 = tpu.matmul %78, %80, %cst_46 {dimension_numbers = #tpu.dot_dimension_numbers<[1], [0], [0], [1], [0, 0, 1, 1], [], []>} : vector<16x128xbf16>, vector<128x128xbf16>, vector<16x128xf32> -> vector<16x128xf32>
    %82 = vector.extract_strided_slice %77 {offsets = [16, 0], sizes = [16, 128], strides = [1, 1]} : vector<64x128xbf16> to vector<16x128xbf16>
    %c1_47 = arith.constant 1 : index
    %c0_48 = arith.constant 0 : index
    %c0_49 = arith.constant 0 : index
    %83 = vector.load %arg6[%c1_47, %c0_48, %c0_49] : memref<4x128x128xbf16, #tpu.memory_space<vmem>>, vector<1x128x128xbf16>
    %84 = vector.shape_cast %83 : vector<1x128x128xbf16> to vector<128x128xbf16>
    %cst_50 = arith.constant dense<0.000000e+00> : vector<16x128xf32>
    %85 = tpu.matmul %82, %84, %cst_50 {dimension_numbers = #tpu.dot_dimension_numbers<[1], [0], [0], [1], [0, 0, 1, 1], [], []>} : vector<16x128xbf16>, vector<128x128xbf16>, vector<16x128xf32> -> vector<16x128xf32>
    %86 = arith.addf %81, %85 : vector<16x128xf32>
    %87 = vector.extract_strided_slice %77 {offsets = [32, 0], sizes = [16, 128], strides = [1, 1]} : vector<64x128xbf16> to vector<16x128xbf16>
    %c2_51 = arith.constant 2 : index
    %c0_52 = arith.constant 0 : index
    %c0_53 = arith.constant 0 : index
    %88 = vector.load %arg6[%c2_51, %c0_52, %c0_53] : memref<4x128x128xbf16, #tpu.memory_space<vmem>>, vector<1x128x128xbf16>
    %89 = vector.shape_cast %88 : vector<1x128x128xbf16> to vector<128x128xbf16>
    %cst_54 = arith.constant dense<0.000000e+00> : vector<16x128xf32>
    %90 = tpu.matmul %87, %89, %cst_54 {dimension_numbers = #tpu.dot_dimension_numbers<[1], [0], [0], [1], [0, 0, 1, 1], [], []>} : vector<16x128xbf16>, vector<128x128xbf16>, vector<16x128xf32> -> vector<16x128xf32>
    %91 = arith.addf %86, %90 : vector<16x128xf32>
    %92 = vector.extract_strided_slice %77 {offsets = [48, 0], sizes = [16, 128], strides = [1, 1]} : vector<64x128xbf16> to vector<16x128xbf16>
    %c3_55 = arith.constant 3 : index
    %c0_56 = arith.constant 0 : index
    %c0_57 = arith.constant 0 : index
    %93 = vector.load %arg6[%c3_55, %c0_56, %c0_57] : memref<4x128x128xbf16, #tpu.memory_space<vmem>>, vector<1x128x128xbf16>
    %94 = vector.shape_cast %93 : vector<1x128x128xbf16> to vector<128x128xbf16>
    %cst_58 = arith.constant dense<0.000000e+00> : vector<16x128xf32>
    %95 = tpu.matmul %92, %94, %cst_58 {dimension_numbers = #tpu.dot_dimension_numbers<[1], [0], [0], [1], [0, 0, 1, 1], [], []>} : vector<16x128xbf16>, vector<128x128xbf16>, vector<16x128xf32> -> vector<16x128xf32>
    %96 = arith.addf %91, %95 : vector<16x128xf32>
    %c0_59 = arith.constant 0 : index
    %c0_60 = arith.constant 0 : index
    %97 = vector.load %arg7[%c0_59, %c0_60] : memref<1x128xf32, #tpu.memory_space<vmem>>, vector<1x128xf32>
    %98 = vector.broadcast %97 : vector<1x128xf32> to vector<16x128xf32>
    %99 = arith.addf %96, %98 : vector<16x128xf32>
    %cst_61 = arith.constant 0.000000e+00 : f32
    %100 = vector.broadcast %cst_61 : f32 to vector<16x128xf32>
    %101 = arith.maximumf %99, %100 : vector<16x128xf32>
    %c0_62 = arith.constant 0 : index
    %c0_63 = arith.constant 0 : index
    %102 = vector.load %arg8[%c0_62, %c0_63] : memref<1x128xf32, #tpu.memory_space<vmem>>, vector<1x128xf32>
    %103 = tpu.transpose %101, [1, 0] : vector<16x128xf32> -> vector<128x16xf32>
    %cst_64 = arith.constant dense<0.000000e+00> : vector<1x16xf32>
    %104 = tpu.matmul %102, %103, %cst_64 {dimension_numbers = #tpu.dot_dimension_numbers<[1], [0], [0], [1], [0, 0, 1, 1], [], []>} : vector<1x128xf32>, vector<128x16xf32>, vector<1x16xf32> -> vector<1x16xf32>
    %c0_65 = arith.constant 0 : index
    %c0_66 = arith.constant 0 : index
    %105 = vector.load %arg9[%c0_65, %c0_66] : memref<1x1xf32, #tpu.memory_space<vmem>>, vector<1x1xf32>
    %106 = vector.broadcast %105 : vector<1x1xf32> to vector<1x16xf32>
    %107 = arith.addf %104, %106 : vector<1x16xf32>
    %cst_67 = arith.constant 0.000000e+00 : f32
    %108 = vector.broadcast %cst_67 : f32 to vector<1x16xf32>
    %109 = arith.subf %108, %107 : vector<1x16xf32>
    %110 = math.exp %109 : vector<1x16xf32>
    %cst_68 = arith.constant 1.000000e+00 : f32
    %111 = vector.broadcast %cst_68 : f32 to vector<1x16xf32>
    %112 = arith.addf %111, %110 : vector<1x16xf32>
    %cst_69 = arith.constant 1.000000e+00 : f32
    %113 = vector.broadcast %cst_69 : f32 to vector<1x16xf32>
    %114 = arith.divf %113, %112 : vector<1x16xf32>
    %c0_70 = arith.constant 0 : index
    %c0_71 = arith.constant 0 : index
    %c0_72 = arith.constant 0 : index
    %115 = vector.load %arg10[%c0_70, %c0_71, %c0_72] : memref<1x1x16xf32, #tpu.memory_space<vmem>>, vector<1x1x16xf32>
    %116 = vector.shape_cast %115 : vector<1x1x16xf32> to vector<1x16xf32>
    %117 = vector.shape_cast %114 : vector<1x16xf32> to vector<1x1x16xf32>
    tpu.vector_store %arg10[%c0_70, %c0_71, %c0_72], %117 {strides = array<i32>} : memref<1x1x16xf32, #tpu.memory_space<vmem>>, vector<1x1x16xf32>,
    return
  }
  func.func @transform_0(%arg0: i32) -> (i32, i32, i32) {
    %c0_i32 = arith.constant 0 : i32
    %c0_i32_0 = arith.constant 0 : i32
    %c0_i32_1 = arith.constant 0 : i32
    return %arg0, %c0_i32, %c0_i32_0 : i32, i32, i32
  }
  func.func @transform_1(%arg0: i32) -> (i32, i32, i32) {
    %c0_i32 = arith.constant 0 : i32
    %c0_i32_0 = arith.constant 0 : i32
    %c0_i32_1 = arith.constant 0 : i32
    %c0_i32_2 = arith.constant 0 : i32
    return %c0_i32, %c0_i32_0, %c0_i32_1 : i32, i32, i32
  }
  func.func @transform_2(%arg0: i32) -> (i32, i32) {
    %c0_i32 = arith.constant 0 : i32
    %c0_i32_0 = arith.constant 0 : i32
    %c0_i32_1 = arith.constant 0 : i32
    return %c0_i32, %c0_i32_0 : i32, i32
  }
  func.func @transform_3(%arg0: i32) -> (i32, i32, i32) {
    %c0_i32 = arith.constant 0 : i32
    %c0_i32_0 = arith.constant 0 : i32
    %c0_i32_1 = arith.constant 0 : i32
    %c0_i32_2 = arith.constant 0 : i32
    return %c0_i32, %c0_i32_0, %c0_i32_1 : i32, i32, i32
  }
  func.func @transform_4(%arg0: i32) -> (i32, i32) {
    %c0_i32 = arith.constant 0 : i32
    %c0_i32_0 = arith.constant 0 : i32
    %c0_i32_1 = arith.constant 0 : i32
    return %c0_i32, %c0_i32_0 : i32, i32
  }
  func.func @transform_5(%arg0: i32) -> (i32, i32, i32) {
    %c0_i32 = arith.constant 0 : i32
    %c0_i32_0 = arith.constant 0 : i32
    %c0_i32_1 = arith.constant 0 : i32
    %c0_i32_2 = arith.constant 0 : i32
    return %c0_i32, %c0_i32_0, %c0_i32_1 : i32, i32, i32
  }
  func.func @transform_6(%arg0: i32) -> (i32, i32) {
    %c0_i32 = arith.constant 0 : i32
    %c0_i32_0 = arith.constant 0 : i32
    %c0_i32_1 = arith.constant 0 : i32
    return %c0_i32, %c0_i32_0 : i32, i32
  }
  func.func @transform_7(%arg0: i32) -> (i32, i32) {
    %c0_i32 = arith.constant 0 : i32
    %c0_i32_0 = arith.constant 0 : i32
    %c0_i32_1 = arith.constant 0 : i32
    return %c0_i32, %c0_i32_0 : i32, i32
  }
  func.func @transform_8(%arg0: i32) -> (i32, i32) {
    %c0_i32 = arith.constant 0 : i32
    %c0_i32_0 = arith.constant 0 : i32
    %c0_i32_1 = arith.constant 0 : i32
    return %c0_i32, %c0_i32_0 : i32, i32
  }
  func.func @transform_9(%arg0: i32) -> (i32, i32, i32) {
    %c0_i32 = arith.constant 0 : i32
    %c0_i32_0 = arith.constant 0 : i32
    %c0_i32_1 = arith.constant 0 : i32
    return %arg0, %c0_i32, %c0_i32_0 : i32, i32, i32
  }
}

</mosaic_0001>

<bundles_post_ra>
// kernel: _forward_impl.1
= control target key start
LH: loop header
LB: loop body
LE: loop exit
PB: predicated region body
PF: predicated region fallthrough
CT: control target
= control target key end

     0   :  { %s6476_s0 = inlined_call_operand.vmem [shape: bf16[1,448,28], index: 0, kind: input, shape index: {}]   ;;  %s6477_s1 = inlined_call_operand.vmem [shape: bf16[5,28,256], index: 1, kind: input, shape index: {}]   ;;  %s6478_s2 = inlined_call_operand.vmem [shape: f32[1,128], index: 2, kind: input, shape index: {}]   ;;  %s6479_s3 = inlined_call_operand.hbm [shape: bf16[5,128,256], index: 3, kind: input, shape index: {}]   ;;  %s6480_s4 = inlined_call_operand.vmem [shape: f32[1,128], index: 4, kind: input, shape index: {}]   ;;  %s6481_s5 = inlined_call_operand.vmem [shape: bf16[4,128,128], index: 5, kind: input, shape index: {}]   ;;  %s6482_s6 = inlined_call_operand.vmem [shape: f32[1,128], index: 6, kind: input, shape index: {}]   ;;  %s6483_s7 = inlined_call_operand.vmem [shape: f32[1,128], index: 7, kind: input, shape index: {}]   ;;  %s6484_s8 = inlined_call_operand.<no memory space> [shape: f32[1,1], index: 8, kind: input, shape index: {}]   ;;  %s6485_s9 = inlined_call_operand.vmem [shape: f32[1,1,16], index: 9, kind: output, shape index: {}]  }
   0x1   :  { %v14_v0 = vstv %s6484_s8 }
   0x2   :  { %15 = vst [vmem:[#allocation2] sm:$0x1] %v14_v0 }
   0x3   :  { %16 = vsyncpa [#allocation4], 0  ;;  %s5238_s11 = smov [#allocation3]   ;;  %s5214_s15 = scalar_lea.hbm %s6479_s3, 10240 }
   0x4   :  { %s28_s12 = sshll.u32 %s5238_s11, 4  ;;  %p5215_p0 = scmp.ne.s32.totalorder %s6479_s3, %s5214_s15  ;;  %s29_s12 = int_to_ptr.vmem [resolvable:$true] %s28_s12 }
   0x5   :  { %p5218_p1 = scmp.lt.u32.totalorder %s5214_s15, %s6479_s3 }
   0x7   :  { %p5220_p2 = pnand %p5218_p1, %p5215_p0 }
   0x9   :  { %5223 = shalt.err (!%p5220_p2)
}
   0xa   :  { %s5224_s8 = scalar_lea.vmem %s29_s12, 10240  ;;  %p5229_p4 = scmp.lt.s32.totalorder %s29_s12, %s29_s12 }
   0xb   :  { %p5225_p3 = scmp.ne.s32.totalorder %s29_s12, %s5224_s8  ;;  %p5230_p5 = scmp.lt.s32.totalorder %s5224_s8, %s5224_s8 }
   0xd   :  { %p5231_p6 = por %p5230_p5, %p5229_p4 }
   0xf   :  { %p5232_p7 = pnand %p5231_p6, %p5225_p3 }
  0x11   :  { %5235 = shalt.err (!%p5232_p7)
}
  0x12   :  { %s5239_s20 = smov 128   ;;  %s5240_s21 = smov 8  }
  0x13   :  { %34 = dma.hbm_to_vmem [thread:$0]  %s6479_s3, 10240, %s29_s12, [#allocation4], %s5239_s20, %s5239_s20, %s5240_s21  }
  0x14   :  { %5236 = dma.done.wait [#allocation4], 10240  }
  0x15   :  { %5237 = vsyncadd [#allocation4], 4294957056  ;;  %v6486_v1 = vmov 0   ;;  %v5316_v2 = vld [vmem:[%s6477_s1 + $0x4] ss:$8 sps:$4 sm:$0xff]   ;;  %vm325_vm0 = vcmask 1045504  }
  0x16   :  { %669 = vmatprep.mubr.bf16.mxu0 %v6486_v1  ;;  %364 = vmatprep.mubr.bf16.mxu1 %v6486_v1  ;;  %v5321_v3 = vld [vmem:[%s6477_s1] ss:$8 sps:$4 sm:$0xff]   ;;  %v5327_v4 = vld [vmem:[%s6477_s1 + $0x14] ss:$8 sps:$4 sm:$0x3f]   ;;  %vm252_vm1 = vcmask 228352  }
  0x17   :  { %4999 = vset.pattern.permute.xlu0 %v6486_v1  ;;  %637 = vmatprep.subr.bf16.mxu0 %v5316_v2  ;;  %v5005_v5 = vld [vmem:[%s6477_s1 + $0x10] ss:$8 sps:$4 sm:$0x3f]   ;;  %v5009_v7 = vld [vmem:[%s6477_s1 + $0x44] ss:$8 sps:$4 sm:$0xff]   ;;  %vm5243_vm2 = vmmov 0  }
  0x18   :  { %638 = vmatpush1.bf16.msra.mxu0 %v5321_v3  ;;  %v5336_v6 = vsel %vm325_vm0, %v5005_v5, 0  ;;  %v5006_v8 = vld [vmem:[%s6476_s0] sm:$0xff]   ;;  %v5017_v10 = vld [vmem:[%s6477_s1 + $0x54] ss:$8 sps:$4 sm:$0x3f]   ;;  %v5359_v12 = vld [vmem:[%s6476_s0 + $0x8] sm:$0xff]  }
  0x19   :  { %4057 = vmatprep.subr.msk.bf16.mxu0 %vm325_vm0, %v5327_v4  ;;  %v5007_v9 = vld [vmem:[%s6477_s1 + $0x40] ss:$8 sps:$4 sm:$0xff]   ;;  %v5019_v11 = vld [vmem:[%s6477_s1 + $0x50] ss:$8 sps:$4 sm:$0x3f]   ;;  %vm3988_vm3 = vcmask 122880  }
  0x1a   :  { %v942_v13 = vsel %vm325_vm0, %v5019_v11, 0  ;;  %v5369_v14 = vld [vmem:[%s6476_s0 + $0x10] sm:$0xff]   ;;  %v5029_v15 = vld [vmem:[%s6477_s1 + $0x64] ss:$8 sps:$4 sm:$0xff]   ;;  %v5380_v16 = vld [vmem:[%s6476_s0 + $0x18] sm:$0xff]  }
  0x1b   :  { %v5388_v17 = vld [vmem:[%s6476_s0 + $0x20] sm:$0xff]   ;;  %v5396_v18 = vld [vmem:[%s6476_s0 + $0x28] sm:$0xff]   ;;  %v5404_v19 = vld [vmem:[%s6476_s0 + $0x30] sm:$0xff]  }
  0x1c   :  { %640 = vmatpush1.bf16.msra.mxu0 %v5336_v6  ;;  %v5412_v20 = vld [vmem:[%s6476_s0 + $0x38] sm:$0xff]   ;;  %v5420_v21 = vld [vmem:[%s6476_s0 + $0x40] sm:$0xff]   ;;  %v5428_v22 = vld [vmem:[%s6476_s0 + $0x48] sm:$0xff]  }
  0x1d   :  { %947 = vmatprep.subr.bf16.mxu0 %v5009_v7  ;;  %v5436_v23 = vld [vmem:[%s6476_s0 + $0x50] sm:$0xff]   ;;  %v5444_v24 = vld [vmem:[%s6476_s0 + $0x58] sm:$0xff]   ;;  %v5452_v25 = vld [vmem:[%s6476_s0 + $0x60] sm:$0xff]  }
  0x1e   :  { %v5460_v26 = vld [vmem:[%s6476_s0 + $0x68] sm:$0xff]   ;;  %v5468_v27 = vld [vmem:[%s6476_s0 + $0x70] sm:$0xff]   ;;  %v5535_v35 = vld [vmem:[%s6476_s0 + $0x78] sm:$0xff]  }
  0x1f   :  { %4058 = vmatmul.mubr.msk.bf16.vlgmr.msra.gmra.mrb[0].mxu0 %vm252_vm1, %v5006_v8  ;;  %v5027_v28 = vld [vmem:[%s6477_s1 + $0x60] ss:$8 sps:$4 sm:$0xff]   ;;  %v5030_v29 = vld [vmem:[%s6477_s1 + $0x74] ss:$8 sps:$4 sm:$0x3f]  }
  0x20   :  { %948 = vmatpush1.bf16.msra.mxu0 %v5007_v9  ;;  %679 = vmatprep.mubr.bf16.mxu0 %v6486_v1  ;;  %v5032_v30 = vld [vmem:[%s6477_s1 + $0x70] ss:$8 sps:$4 sm:$0x3f]   ;;  %v5046_v32 = vld [vmem:[%s6477_s1 + $0x84] ss:$8 sps:$4 sm:$0xff]  }
  0x21   :  { %4091 = vmatprep.subr.msk.bf16.mxu0 %vm325_vm0, %v5017_v10  ;;  %v1348_v31 = vsel %vm325_vm0, %v5032_v30, 0  ;;  %v5047_v33 = vld [vmem:[%s6477_s1 + $0x24] ss:$8 sps:$4 sm:$0xff]   ;;  %v5049_v34 = vld [vmem:[%s6477_s1 + $0x20] ss:$8 sps:$4 sm:$0xff]   ;;  %v5578_v41 = vld [vmem:[%s6476_s0 + $0x90] sm:$0xff]  }
  0x22   :  { %332 = vmatprep.subr.bf16.mxu1 %v5047_v33  ;;  %v5050_v36 = vld [vmem:[%s6477_s1 + $0x34] ss:$8 sps:$4 sm:$0x3f]   ;;  %v5052_v37 = vld [vmem:[%s6477_s1 + $0x30] ss:$8 sps:$4 sm:$0x3f]  }
  0x23   :  { %333 = vmatpush1.bf16.msra.mxu1 %v5049_v34  ;;  %v327_v38 = vsel %vm325_vm0, %v5052_v37, 0  ;;  %v5552_v39 = vld [vmem:[%s6476_s0 + $0x80] sm:$0xff]   ;;  %v5567_v40 = vld [vmem:[%s6476_s0 + $0x88] sm:$0xff]   ;;  %v5589_v42 = vld [vmem:[%s6476_s0 + $0x98] sm:$0xff]  }
  0x24   :  { %950 = vmatpush1.bf16.msra.mxu0 %v942_v13  ;;  %4027 = vmatprep.subr.msk.bf16.mxu1 %vm325_vm0, %v5050_v36  ;;  %v5600_v43 = vld [vmem:[%s6476_s0 + $0xa0] sm:$0xff]   ;;  %v5611_v44 = vld [vmem:[%s6476_s0 + $0xa8] sm:$0xff]   ;;  %v5622_v45 = vld [vmem:[%s6476_s0 + $0xb0] sm:$0xff]  }
  0x25   :  { %1353 = vmatprep.subr.bf16.mxu0 %v5029_v15  ;;  %v5633_v46 = vld [vmem:[%s6476_s0 + $0xb8] sm:$0xff]   ;;  %v5644_v47 = vld [vmem:[%s6476_s0 + $0xc0] sm:$0xff]   ;;  %v5655_v48 = vld [vmem:[%s6476_s0 + $0xc8] sm:$0xff]  }
  0x26   :  { %v5044_v49 = vld [vmem:[%s6477_s1 + $0x80] ss:$8 sps:$4 sm:$0xff]   ;;  %v5053_v50 = vld [vmem:[%s6477_s1 + $0x94] ss:$8 sps:$4 sm:$0x3f]  }
  0x27   :  { %4059 = vmatmul.mubr.msk.bf16.gmra.mrb[4].mxu0 %vm252_vm1, %v5359_v12  ;;  %335 = vmatpush1.bf16.msra.mxu1 %v327_v38  ;;  %v5055_v51 = vld [vmem:[%s6477_s1 + $0x90] ss:$8 sps:$4 sm:$0x3f]  }
  0x28   :  { %689 = vmatprep.mubr.bf16.mxu0 %v6486_v1  ;;  %4476 = vmatprep.subr.bf16.mxu1 %v5316_v2  ;;  %v1754_v52 = vsel %vm325_vm0, %v5055_v51, 0  ;;  %v5815_v53 = vld [vmem:[%s6476_s0 + $0xd0] sm:$0xff]  }
  0x29   :  { %v5060_v36 = vld [vmem:[#allocation3 + $0x84] ss:$8 sps:$4 sm:$0xff]  }
  0x2a   :  { %4028 = vmatmul.mubr.msk.bf16.vlgmr.msra.gmra.mrb[0].mxu1 %vm252_vm1, %v5359_v12  ;;  %v5066_v51 = vld [vmem:[#allocation3 + $0xa4] ss:$8 sps:$4 sm:$0xff]  }
  0x2b   :  { %374 = vmatprep.mubr.bf16.mxu1 %v6486_v1  ;;  %4478 = vmatpush1.bf16.msra.mxu1 %v5321_v3 }
  0x2c   :  { %4477 = vmatprep.subr.msk.bf16.mxu1 %vm325_vm0, %v5327_v4 }
  0x2f   :  { %4060 = vmatmul.mubr.msk.bf16.gmra.mrb[8].mxu0 %vm252_vm1, %v5369_v14  ;;  %4479 = vmatpush1.bf16.msra.mxu1 %v5336_v6 }
  0x30   :  { %699 = vmatprep.mubr.bf16.mxu0 %v6486_v1  ;;  %2380 = vmatprep.subr.bf16.mxu1 %v5060_v36  ;;  %v5069_v36 = vld [vmem:[#allocation3 + $0xb4] ss:$8 sps:$4 sm:$0xff]  }
  0x32   :  { %4029 = vmatmul.mubr.msk.bf16.gmra.mrb[4].mxu1 %vm252_vm1, %v5369_v14 }
  0x33   :  { %384 = vmatprep.mubr.bf16.mxu1 %v6486_v1 }
  0x37   :  { %4061 = vmatmul.mubr.msk.bf16.gmra.mrb[12].mxu0 %vm252_vm1, %v5380_v16 }
  0x38   :  { %709 = vmatprep.mubr.bf16.mxu0 %v6486_v1 }
  0x3a   :  { %4030 = vmatmul.mubr.msk.bf16.gmra.mrb[8].mxu1 %vm252_vm1, %v5380_v16 }
  0x3b   :  { %394 = vmatprep.mubr.bf16.mxu1 %v6486_v1 }
  0x3f   :  { %4062 = vmatmul.mubr.msk.bf16.gmra.mrb[16].mxu0 %vm252_vm1, %v5388_v17 }
  0x40   :  { %719 = vmatprep.mubr.bf16.mxu0 %v6486_v1 }
  0x42   :  { %4031 = vmatmul.mubr.msk.bf16.gmra.mrb[12].mxu1 %vm252_vm1, %v5388_v17 }
  0x43   :  { %404 = vmatprep.mubr.bf16.mxu1 %v6486_v1 }
  0x47   :  { %4063 = vmatmul.mubr.msk.bf16.gmra.mrb[20].mxu0 %vm252_vm1, %v5396_v18 }
  0x48   :  { %729 = vmatprep.mubr.bf16.mxu0 %v6486_v1 }
  0x4a   :  { %4032 = vmatmul.mubr.msk.bf16.gmra.mrb[16].mxu1 %vm252_vm1, %v5396_v18 }
  0x4b   :  { %414 = vmatprep.mubr.bf16.mxu1 %v6486_v1 }
  0x4f   :  { %4064 = vmatmul.mubr.msk.bf16.gmra.mrb[24].mxu0 %vm252_vm1, %v5404_v19 }
  0x50   :  { %739 = vmatprep.mubr.bf16.mxu0 %v6486_v1 }
  0x52   :  { %4033 = vmatmul.mubr.msk.bf16.gmra.mrb[20].mxu1 %vm252_vm1, %v5404_v19 }
  0x53   :  { %424 = vmatprep.mubr.bf16.mxu1 %v6486_v1 }
  0x57   :  { %4065 = vmatmul.mubr.msk.bf16.gmra.mrb[28].mxu0 %vm252_vm1, %v5412_v20 }
  0x58   :  { %749 = vmatprep.mubr.bf16.mxu0 %v6486_v1 }
  0x5a   :  { %4034 = vmatmul.mubr.msk.bf16.gmra.mrb[24].mxu1 %vm252_vm1, %v5412_v20 }
  0x5b   :  { %434 = vmatprep.mubr.bf16.mxu1 %v6486_v1 }
  0x5f   :  { %4066 = vmatmul.mubr.msk.bf16.gmra.mrb[32].mxu0 %vm252_vm1, %v5420_v21 }
  0x60   :  { %759 = vmatprep.mubr.bf16.mxu0 %v6486_v1 }
  0x62   :  { %4035 = vmatmul.mubr.msk.bf16.gmra.mrb[28].mxu1 %vm252_vm1, %v5420_v21 }
  0x63   :  { %444 = vmatprep.mubr.bf16.mxu1 %v6486_v1 }
  0x67   :  { %4067 = vmatmul.mubr.msk.bf16.gmra.mrb[36].mxu0 %vm252_vm1, %v5428_v22 }
  0x68   :  { %769 = vmatprep.mubr.bf16.mxu0 %v6486_v1 }
  0x6a   :  { %4036 = vmatmul.mubr.msk.bf16.gmra.mrb[32].mxu1 %vm252_vm1, %v5428_v22 }
  0x6b   :  { %454 = vmatprep.mubr.bf16.mxu1 %v6486_v1 }
  0x6f   :  { %4068 = vmatmul.mubr.msk.bf16.gmra.mrb[40].mxu0 %vm252_vm1, %v5436_v23 }
  0x70   :  { %779 = vmatprep.mubr.bf16.mxu0 %v6486_v1 }
  0x72   :  { %4037 = vmatmul.mubr.msk.bf16.gmra.mrb[36].mxu1 %vm252_vm1, %v5436_v23 }
  0x73   :  { %464 = vmatprep.mubr.bf16.mxu1 %v6486_v1 }
  0x77   :  { %4069 = vmatmul.mubr.msk.bf16.gmra.mrb[44].mxu0 %vm252_vm1, %v5444_v24 }
  0x78   :  { %789 = vmatprep.mubr.bf16.mxu0 %v6486_v1 }
  0x7a   :  { %4038 = vmatmul.mubr.msk.bf16.gmra.mrb[40].mxu1 %vm252_vm1, %v5444_v24 }
  0x7b   :  { %474 = vmatprep.mubr.bf16.mxu1 %v6486_v1 }
  0x7f   :  { %4070 = vmatmul.mubr.msk.bf16.gmra.mrb[48].mxu0 %vm252_vm1, %v5452_v25 }
  0x80   :  { %799 = vmatprep.mubr.bf16.mxu0 %v6486_v1 }
  0x82   :  { %4039 = vmatmul.mubr.msk.bf16.gmra.mrb[44].mxu1 %vm252_vm1, %v5452_v25 }
  0x83   :  { %484 = vmatprep.mubr.bf16.mxu1 %v6486_v1 }
  0x87   :  { %4071 = vmatmul.mubr.msk.bf16.gmra.mrb[52].mxu0 %vm252_vm1, %v5460_v26 }
  0x88   :  { %809 = vmatprep.mubr.bf16.mxu0 %v6486_v1 }
  0x8a   :  { %4040 = vmatmul.mubr.msk.bf16.gmra.mrb[48].mxu1 %vm252_vm1, %v5460_v26 }
  0x8b   :  { %494 = vmatprep.mubr.bf16.mxu1 %v6486_v1 }
  0x8f   :  { %4072 = vmatmul.mubr.msk.bf16.gmra.mrb[56].mxu0 %vm252_vm1, %v5468_v27 }
  0x90   :  { %979 = vmatprep.mubr.bf16.mxu0 %v6486_v1 }
  0x92   :  { %4041 = vmatmul.mubr.msk.bf16.gmra.mrb[52].mxu1 %vm252_vm1, %v5468_v27 }
  0x93   :  { %504 = vmatprep.mubr.bf16.mxu1 %v6486_v1 }
  0x97   :  { %4092 = vmatmul.mubr.msk.bf16.vlgmr.msra.gmra.mrb[0].mxu0 %vm252_vm1, %v5369_v14 }
  0x98   :  { %1354 = vmatpush1.bf16.msra.mxu0 %v5027_v28  ;;  %989 = vmatprep.mubr.bf16.mxu0 %v6486_v1 }
  0x99   :  { %4125 = vmatprep.subr.msk.bf16.mxu0 %vm325_vm0, %v5030_v29 }
  0x9a   :  { %4042 = vmatmul.mubr.msk.bf16.gmra.mrb[56].mxu1 %vm252_vm1, %v5535_v35 }
  0x9b   :  { %514 = vmatprep.mubr.bf16.mxu1 %v6486_v1 }
  0x9c   :  { %1356 = vmatpush1.bf16.msra.mxu0 %v1348_v31 }
  0x9d   :  { %1759 = vmatprep.subr.bf16.mxu0 %v5046_v32 }
  0x9f   :  { %4093 = vmatmul.mubr.msk.bf16.gmra.mrb[4].mxu0 %vm252_vm1, %v5380_v16 }
  0xa0   :  { %999 = vmatprep.mubr.bf16.mxu0 %v6486_v1 }
  0xa2   :  { %4043 = vmatmul.mubr.msk.bf16.gmra.mrb[60].mxu1 %vm252_vm1, %v5552_v39 }
  0xa3   :  { %524 = vmatprep.mubr.bf16.mxu1 %v6486_v1 }
  0xa7   :  { %4094 = vmatmul.mubr.msk.bf16.gmra.mrb[8].mxu0 %vm252_vm1, %v5388_v17 }
  0xa8   :  { %1009 = vmatprep.mubr.bf16.mxu0 %v6486_v1 }
  0xaa   :  { %4044 = vmatmul.mubr.msk.bf16.gmra.mrb[64].mxu1 %vm252_vm1, %v5567_v40 }
  0xab   :  { %534 = vmatprep.mubr.bf16.mxu1 %v6486_v1 }
  0xaf   :  { %4095 = vmatmul.mubr.msk.bf16.gmra.mrb[12].mxu0 %vm252_vm1, %v5396_v18 }
  0xb0   :  { %1019 = vmatprep.mubr.bf16.mxu0 %v6486_v1 }
  0xb2   :  { %4045 = vmatmul.mubr.msk.bf16.gmra.mrb[68].mxu1 %vm252_vm1, %v5578_v41 }
  0xb3   :  { %544 = vmatprep.mubr.bf16.mxu1 %v6486_v1 }
  0xb7   :  { %4096 = vmatmul.mubr.msk.bf16.gmra.mrb[16].mxu0 %vm252_vm1, %v5404_v19 }
  0xb8   :  { %1029 = vmatprep.mubr.bf16.mxu0 %v6486_v1 }
  0xba   :  { %4046 = vmatmul.mubr.msk.bf16.gmra.mrb[72].mxu1 %vm252_vm1, %v5589_v42 }
  0xbb   :  { %554 = vmatprep.mubr.bf16.mxu1 %v6486_v1 }
  0xbf   :  { %4097 = vmatmul.mubr.msk.bf16.gmra.mrb[20].mxu0 %vm252_vm1, %v5412_v20 }
  0xc0   :  { %1039 = vmatprep.mubr.bf16.mxu0 %v6486_v1 }
  0xc2   :  { %4047 = vmatmul.mubr.msk.bf16.gmra.mrb[76].mxu1 %vm252_vm1, %v5600_v43 }
  0xc3   :  { %564 = vmatprep.mubr.bf16.mxu1 %v6486_v1 }
  0xc7   :  { %4098 = vmatmul.mubr.msk.bf16.gmra.mrb[24].mxu0 %vm252_vm1, %v5420_v21 }
  0xc8   :  { %1049 = vmatprep.mubr.bf16.mxu0 %v6486_v1 }
  0xca   :  { %4048 = vmatmul.mubr.msk.bf16.gmra.mrb[80].mxu1 %vm252_vm1, %v5611_v44 }
  0xcb   :  { %574 = vmatprep.mubr.bf16.mxu1 %v6486_v1 }
  0xcf   :  { %4099 = vmatmul.mubr.msk.bf16.gmra.mrb[28].mxu0 %vm252_vm1, %v5428_v22 }
  0xd0   :  { %1059 = vmatprep.mubr.bf16.mxu0 %v6486_v1 }
  0xd2   :  { %4049 = vmatmul.mubr.msk.bf16.gmra.mrb[84].mxu1 %vm252_vm1, %v5622_v45 }
  0xd3   :  { %584 = vmatprep.mubr.bf16.mxu1 %v6486_v1 }
  0xd7   :  { %4100 = vmatmul.mubr.msk.bf16.gmra.mrb[32].mxu0 %vm252_vm1, %v5436_v23 }
  0xd8   :  { %1069 = vmatprep.mubr.bf16.mxu0 %v6486_v1 }
  0xda   :  { %4050 = vmatmul.mubr.msk.bf16.gmra.mrb[88].mxu1 %vm252_vm1, %v5633_v46 }
  0xdb   :  { %594 = vmatprep.mubr.bf16.mxu1 %v6486_v1 }
  0xdf   :  { %4101 = vmatmul.mubr.msk.bf16.gmra.mrb[36].mxu0 %vm252_vm1, %v5444_v24 }
  0xe0   :  { %1079 = vmatprep.mubr.bf16.mxu0 %v6486_v1 }
  0xe2   :  { %4051 = vmatmul.mubr.msk.bf16.gmra.mrb[92].mxu1 %vm252_vm1, %v5644_v47 }
  0xe3   :  { %819 = vmatprep.mubr.bf16.mxu1 %v6486_v1 }
  0xe7   :  { %4102 = vmatmul.mubr.msk.bf16.gmra.mrb[40].mxu0 %vm252_vm1, %v5452_v25 }
  0xe8   :  { %1089 = vmatprep.mubr.bf16.mxu0 %v6486_v1 }
  0xea   :  { %4073 = vmatmul.mubr.msk.bf16.vlgmr.msra.gmra.mrb[60].mxu1 %vm252_vm1, %v5535_v35 }
  0xeb   :  { %829 = vmatprep.mubr.bf16.mxu1 %v6486_v1 }
  0xef   :  { %4103 = vmatmul.mubr.msk.bf16.gmra.mrb[44].mxu0 %vm252_vm1, %v5460_v26 }
  0xf0   :  { %1099 = vmatprep.mubr.bf16.mxu0 %v6486_v1 }
  0xf2   :  { %4074 = vmatmul.mubr.msk.bf16.gmra.mrb[64].mxu1 %vm252_vm1, %v5552_v39 }
  0xf3   :  { %839 = vmatprep.mubr.bf16.mxu1 %v6486_v1 }
  0xf7   :  { %4104 = vmatmul.mubr.msk.bf16.gmra.mrb[48].mxu0 %vm252_vm1, %v5468_v27 }
  0xf8   :  { %1109 = vmatprep.mubr.bf16.mxu0 %v6486_v1 }
  0xfa   :  { %4075 = vmatmul.mubr.msk.bf16.gmra.mrb[68].mxu1 %vm252_vm1, %v5567_v40 }
  0xfb   :  { %849 = vmatprep.mubr.bf16.mxu1 %v6486_v1 }
  0xfd   :  { %v5823_v54 = vpop.f32.mrb[0].mxu1 }
  0xfe   :  { %v5827_v55 = vpop.f32.mrb[1].mxu1 }
  0xff   :  { %4105 = vmatmul.mubr.msk.bf16.gmra.mrb[52].mxu0 %vm252_vm1, %v5535_v35  ;;  %v5830_v56 = vpop.f32.mrb[2].mxu1 }
 0x100   :  { %1119 = vmatprep.mubr.bf16.mxu0 %v6486_v1  ;;  %v5832_v57 = vpop.f32.mrb[3].mxu1 }
 0x102   :  { %4076 = vmatmul.mubr.msk.bf16.gmra.mrb[72].mxu1 %vm252_vm1, %v5578_v41 }
 0x103   :  { %859 = vmatprep.mubr.bf16.mxu1 %v6486_v1 }
 0x105   :  { %v5834_v58 = vpop.f32.mrb[4].mxu1 }
 0x106   :  { %v5838_v59 = vpop.f32.mrb[5].mxu1 }
 0x107   :  { %4106 = vmatmul.mubr.msk.bf16.gmra.mrb[56].mxu0 %vm252_vm1, %v5552_v39  ;;  %v5841_v60 = vpop.f32.mrb[6].mxu1 }
 0x108   :  { %1129 = vmatprep.mubr.bf16.mxu0 %v6486_v1  ;;  %v5843_v61 = vpop.f32.mrb[7].mxu1 }
 0x10a   :  { %4077 = vmatmul.mubr.msk.bf16.gmra.mrb[76].mxu1 %vm252_vm1, %v5589_v42 }
 0x10b   :  { %869 = vmatprep.mubr.bf16.mxu1 %v6486_v1 }
 0x10d   :  { %v5845_v62 = vpop.f32.mrb[8].mxu1 }
 0x10e   :  { %v5849_v63 = vpop.f32.mrb[9].mxu1 }
 0x10f   :  { %4107 = vmatmul.mubr.msk.bf16.gmra.mrb[60].mxu0 %vm252_vm1, %v5567_v40  ;;  %v5852_v0 = vpop.f32.mrb[10].mxu1 }
 0x110   :  { %1139 = vmatprep.mubr.bf16.mxu0 %v6486_v1  ;;  %v5854_v2 = vpop.f32.mrb[11].mxu1 }
 0x112   :  { %4078 = vmatmul.mubr.msk.bf16.gmra.mrb[80].mxu1 %vm252_vm1, %v5600_v43 }
 0x113   :  { %879 = vmatprep.mubr.bf16.mxu1 %v6486_v1 }
 0x115   :  { %v5856_v3 = vpop.f32.mrb[12].mxu1 }
 0x116   :  { %v5860_v4 = vpop.f32.mrb[13].mxu1 }
 0x117   :  { %4108 = vmatmul.mubr.msk.bf16.gmra.mrb[64].mxu0 %vm252_vm1, %v5578_v41  ;;  %v5863_v5 = vpop.f32.mrb[14].mxu1 }
 0x118   :  { %1149 = vmatprep.mubr.bf16.mxu0 %v6486_v1  ;;  %v5865_v6 = vpop.f32.mrb[15].mxu1 }
 0x11a   :  { %4079 = vmatmul.mubr.msk.bf16.gmra.mrb[84].mxu1 %vm252_vm1, %v5611_v44 }
 0x11b   :  { %889 = vmatprep.mubr.bf16.mxu1 %v6486_v1 }
 0x11d   :  { %v5867_v7 = vpop.f32.mrb[16].mxu1 }
 0x11e   :  { %v5871_v8 = vpop.f32.mrb[17].mxu1 }
 0x11f   :  { %4109 = vmatmul.mubr.msk.bf16.gmra.mrb[68].mxu0 %vm252_vm1, %v5589_v42  ;;  %v5874_v9 = vpop.f32.mrb[18].mxu1 }
 0x120   :  { %1159 = vmatprep.mubr.bf16.mxu0 %v6486_v1  ;;  %v5876_v10 = vpop.f32.mrb[19].mxu1 }
 0x122   :  { %4080 = vmatmul.mubr.msk.bf16.gmra.mrb[88].mxu1 %vm252_vm1, %v5622_v45 }
 0x123   :  { %899 = vmatprep.mubr.bf16.mxu1 %v6486_v1 }
 0x125   :  { %v5878_v11 = vpop.f32.mrb[20].mxu1 }
 0x126   :  { %v5882_v12 = vpop.f32.mrb[21].mxu1 }
 0x127   :  { %4110 = vmatmul.mubr.msk.bf16.gmra.mrb[72].mxu0 %vm252_vm1, %v5600_v43  ;;  %v5885_v13 = vpop.f32.mrb[22].mxu1 }
 0x128   :  { %1169 = vmatprep.mubr.bf16.mxu0 %v6486_v1  ;;  %v5887_v14 = vpop.f32.mrb[23].mxu1 }
 0x12a   :  { %4081 = vmatmul.mubr.msk.bf16.gmra.mrb[92].mxu1 %vm252_vm1, %v5633_v46 }
 0x12b   :  { %2412 = vmatprep.mubr.bf16.mxu1 %v6486_v1 }
 0x12d   :  { %v5889_v15 = vpop.f32.mrb[24].mxu1 }
 0x12f   :  { %4111 = vmatmul.mubr.msk.bf16.gmra.mrb[76].mxu0 %vm252_vm1, %v5611_v44 }
 0x130   :  { %1179 = vmatprep.mubr.bf16.mxu0 %v6486_v1 }
 0x137   :  { %4112 = vmatmul.mubr.msk.bf16.gmra.mrb[80].mxu0 %vm252_vm1, %v5622_v45 }
 0x138   :  { %1189 = vmatprep.mubr.bf16.mxu0 %v6486_v1 }
 0x13f   :  { %4113 = vmatmul.mubr.msk.bf16.gmra.mrb[84].mxu0 %vm252_vm1, %v5633_v46 }
 0x140   :  { %1199 = vmatprep.mubr.bf16.mxu0 %v6486_v1 }
 0x147   :  { %4114 = vmatmul.mubr.msk.bf16.gmra.mrb[88].mxu0 %vm252_vm1, %v5644_v47 }
 0x148   :  { %1209 = vmatprep.mubr.bf16.mxu0 %v6486_v1 }
 0x14f   :  { %4115 = vmatmul.mubr.msk.bf16.gmra.mrb[92].mxu0 %vm252_vm1, %v5655_v48 }
 0x150   :  { %1385 = vmatprep.mubr.bf16.mxu0 %v6486_v1 }
 0x157   :  { %4126 = vmatmul.mubr.msk.bf16.vlgmr.msra.gmra.mrb[0].mxu0 %vm252_vm1, %v5380_v16  ;;  %v5893_v16 = vpop.f32.mrb[25].mxu1 }
 0x158   :  { %1760 = vmatpush1.bf16.msra.mxu0 %v5044_v49  ;;  %1395 = vmatprep.mubr.bf16.mxu0 %v6486_v1  ;;  %v5061_v49 = vld [vmem:[#allocation3 + $0x90] ss:$8 sps:$4 sm:$0xff]  }
 0x159   :  { %4159 = vmatprep.subr.msk.bf16.mxu0 %vm325_vm0, %v5053_v50 }
 0x15c   :  { %1762 = vmatpush1.bf16.msra.mxu0 %v1754_v52 }
 0x15f   :  { %4127 = vmatmul.mubr.msk.bf16.gmra.mrb[4].mxu0 %vm252_vm1, %v5388_v17 }
 0x160   :  { %1405 = vmatprep.mubr.bf16.mxu0 %v6486_v1 }
 0x167   :  { %4128 = vmatmul.mubr.msk.bf16.gmra.mrb[8].mxu0 %vm252_vm1, %v5396_v18 }
 0x168   :  { %1415 = vmatprep.mubr.bf16.mxu0 %v6486_v1 }
 0x16f   :  { %4129 = vmatmul.mubr.msk.bf16.gmra.mrb[12].mxu0 %vm252_vm1, %v5404_v19 }
 0x170   :  { %1425 = vmatprep.mubr.bf16.mxu0 %v6486_v1 }
 0x177   :  { %4130 = vmatmul.mubr.msk.bf16.gmra.mrb[16].mxu0 %vm252_vm1, %v5412_v20 }
 0x178   :  { %1435 = vmatprep.mubr.bf16.mxu0 %v6486_v1 }
 0x17f   :  { %4131 = vmatmul.mubr.msk.bf16.gmra.mrb[20].mxu0 %vm252_vm1, %v5420_v21 }
 0x180   :  { %1445 = vmatprep.mubr.bf16.mxu0 %v6486_v1 }
 0x187   :  { %4132 = vmatmul.mubr.msk.bf16.gmra.mrb[24].mxu0 %vm252_vm1, %v5428_v22 }
 0x188   :  { %1455 = vmatprep.mubr.bf16.mxu0 %v6486_v1 }
 0x18f   :  { %4133 = vmatmul.mubr.msk.bf16.gmra.mrb[28].mxu0 %vm252_vm1, %v5436_v23 }
 0x190   :  { %1465 = vmatprep.mubr.bf16.mxu0 %v6486_v1 }
 0x197   :  { %4134 = vmatmul.mubr.msk.bf16.gmra.mrb[32].mxu0 %vm252_vm1, %v5444_v24 }
 0x198   :  { %1475 = vmatprep.mubr.bf16.mxu0 %v6486_v1 }
 0x19f   :  { %4135 = vmatmul.mubr.msk.bf16.gmra.mrb[36].mxu0 %vm252_vm1, %v5452_v25 }
 0x1a0   :  { %1485 = vmatprep.mubr.bf16.mxu0 %v6486_v1 }
 0x1a7   :  { %4136 = vmatmul.mubr.msk.bf16.gmra.mrb[40].mxu0 %vm252_vm1, %v5460_v26 }
 0x1a8   :  { %1495 = vmatprep.mubr.bf16.mxu0 %v6486_v1 }
 0x1af   :  { %4137 = vmatmul.mubr.msk.bf16.gmra.mrb[44].mxu0 %vm252_vm1, %v5468_v27 }
 0x1b0   :  { %1505 = vmatprep.mubr.bf16.mxu0 %v6486_v1 }
 0x1b7   :  { %4138 = vmatmul.mubr.msk.bf16.gmra.mrb[48].mxu0 %vm252_vm1, %v5535_v35 }
 0x1b8   :  { %1515 = vmatprep.mubr.bf16.mxu0 %v6486_v1 }
 0x1bf   :  { %4139 = vmatmul.mubr.msk.bf16.gmra.mrb[52].mxu0 %vm252_vm1, %v5552_v39 }
 0x1c0   :  { %1525 = vmatprep.mubr.bf16.mxu0 %v6486_v1 }
 0x1c7   :  { %4140 = vmatmul.mubr.msk.bf16.gmra.mrb[56].mxu0 %vm252_vm1, %v5567_v40 }
 0x1c8   :  { %1535 = vmatprep.mubr.bf16.mxu0 %v6486_v1 }
 0x1cf   :  { %4141 = vmatmul.mubr.msk.bf16.gmra.mrb[60].mxu0 %vm252_vm1, %v5578_v41 }
 0x1d0   :  { %1545 = vmatprep.mubr.bf16.mxu0 %v6486_v1 }
 0x1d7   :  { %4142 = vmatmul.mubr.msk.bf16.gmra.mrb[64].mxu0 %vm252_vm1, %v5589_v42 }
 0x1d8   :  { %1555 = vmatprep.mubr.bf16.mxu0 %v6486_v1 }
 0x1df   :  { %4143 = vmatmul.mubr.msk.bf16.gmra.mrb[68].mxu0 %vm252_vm1, %v5600_v43 }
 0x1e0   :  { %1565 = vmatprep.mubr.bf16.mxu0 %v6486_v1 }
 0x1e7   :  { %4144 = vmatmul.mubr.msk.bf16.gmra.mrb[72].mxu0 %vm252_vm1, %v5611_v44 }
 0x1e8   :  { %1575 = vmatprep.mubr.bf16.mxu0 %v6486_v1 }
 0x1ef   :  { %4145 = vmatmul.mubr.msk.bf16.gmra.mrb[76].mxu0 %vm252_vm1, %v5622_v45 }
 0x1f0   :  { %1585 = vmatprep.mubr.bf16.mxu0 %v6486_v1 }
 0x1f7   :  { %4146 = vmatmul.mubr.msk.bf16.gmra.mrb[80].mxu0 %vm252_vm1, %v5633_v46 }
 0x1f8   :  { %1595 = vmatprep.mubr.bf16.mxu0 %v6486_v1 }
 0x1ff   :  { %4147 = vmatmul.mubr.msk.bf16.gmra.mrb[84].mxu0 %vm252_vm1, %v5644_v47 }
 0x200   :  { %1605 = vmatprep.mubr.bf16.mxu0 %v6486_v1 }
 0x207   :  { %4148 = vmatmul.mubr.msk.bf16.gmra.mrb[88].mxu0 %vm252_vm1, %v5655_v48 }
 0x208   :  { %1615 = vmatprep.mubr.bf16.mxu0 %v6486_v1 }
 0x20f   :  { %4149 = vmatmul.mubr.msk.bf16.gmra.mrb[92].mxu0 %vm252_vm1, %v5815_v53 }
 0x210   :  { %1791 = vmatprep.mubr.bf16.mxu0 %v6486_v1 }
 0x217   :  { %4160 = vmatmul.mubr.msk.bf16.vlgmr.msra.gmra.mrb[0].mxu0 %vm252_vm1, %v5388_v17  ;;  %v5896_v17 = vpop.f32.mrb[26].mxu1 }
 0x218   :  { %1801 = vmatprep.mubr.bf16.mxu0 %v6486_v1 }
 0x21f   :  { %4161 = vmatmul.mubr.msk.bf16.gmra.mrb[4].mxu0 %vm252_vm1, %v5396_v18  ;;  %v5898_v18 = vpop.f32.mrb[27].mxu1 }
 0x220   :  { %1811 = vmatprep.mubr.bf16.mxu0 %v6486_v1 }
 0x227   :  { %4162 = vmatmul.mubr.msk.bf16.gmra.mrb[8].mxu0 %vm252_vm1, %v5404_v19  ;;  %v5900_v19 = vpop.f32.mrb[28].mxu1 }
 0x228   :  { %1821 = vmatprep.mubr.bf16.mxu0 %v6486_v1 }
 0x22f   :  { %4163 = vmatmul.mubr.msk.bf16.gmra.mrb[12].mxu0 %vm252_vm1, %v5412_v20  ;;  %v5902_v20 = vpop.f32.mrb[29].mxu1 }
 0x230   :  { %1831 = vmatprep.mubr.bf16.mxu0 %v6486_v1 }
 0x237   :  { %4164 = vmatmul.mubr.msk.bf16.gmra.mrb[16].mxu0 %vm252_vm1, %v5420_v21  ;;  %v5904_v21 = vpop.f32.mrb[30].mxu1 }
 0x238   :  { %1841 = vmatprep.mubr.bf16.mxu0 %v6486_v1 }
 0x23f   :  { %4165 = vmatmul.mubr.msk.bf16.gmra.mrb[20].mxu0 %vm252_vm1, %v5428_v22  ;;  %v5906_v22 = vpop.f32.mrb[31].mxu1 }
 0x240   :  { %1851 = vmatprep.mubr.bf16.mxu0 %v6486_v1 }
 0x247   :  { %4166 = vmatmul.mubr.msk.bf16.gmra.mrb[24].mxu0 %vm252_vm1, %v5436_v23  ;;  %v5908_v23 = vpop.f32.mrb[32].mxu1 }
 0x248   :  { %1861 = vmatprep.mubr.bf16.mxu0 %v6486_v1 }
 0x24f   :  { %4167 = vmatmul.mubr.msk.bf16.gmra.mrb[28].mxu0 %vm252_vm1, %v5444_v24  ;;  %v5912_v24 = vpop.f32.mrb[33].mxu1 }
 0x250   :  { %1871 = vmatprep.mubr.bf16.mxu0 %v6486_v1  ;;  %v5915_v28 = vpop.f32.mrb[34].mxu1 }
 0x251   :  { %v5917_v29 = vpop.f32.mrb[35].mxu1 }
 0x252   :  { %v5919_v30 = vpop.f32.mrb[36].mxu1 }
 0x253   :  { %v5921_v31 = vpop.f32.mrb[37].mxu1 }
 0x254   :  { %v5923_v32 = vpop.f32.mrb[38].mxu1 }
 0x255   :  { %v5925_v33 = vpop.f32.mrb[39].mxu1 }
 0x257   :  { %4168 = vmatmul.mubr.msk.bf16.gmra.mrb[32].mxu0 %vm252_vm1, %v5452_v25  ;;  %v5935_v25 = vpop.f32.mrb[40].mxu1 }
 0x258   :  { %1881 = vmatprep.mubr.bf16.mxu0 %v6486_v1  ;;  %v5938_v34 = vpop.f32.mrb[41].mxu1 }
 0x259   :  { %v5940_v37 = vpop.f32.mrb[42].mxu1 }
 0x25a   :  { %6488 = vst [vmem:[#allocation6_spill] sm:$0xff] %v5940_v37  ;;  %v5942_v38 = vpop.f32.mrb[43].mxu1  ;;  %v5064_v37 = vld [vmem:[#allocation3 + $0xa0] ss:$8 sps:$4 sm:$0xff]  }
 0x25b   :  { %6489 = vst [vmem:[#allocation7_spill] sm:$0xff] %v5942_v38 }
 0x25f   :  { %4169 = vmatmul.mubr.msk.bf16.gmra.mrb[36].mxu0 %vm252_vm1, %v5460_v26  ;;  %v5058_v26 = vld [vmem:[#allocation3 + $0x80] ss:$8 sps:$4 sm:$0xff]  }
 0x260   :  { %1891 = vmatprep.mubr.bf16.mxu0 %v6486_v1  ;;  %2381 = vmatpush1.bf16.msra.mxu1 %v5058_v26  ;;  %v5067_v26 = vld [vmem:[#allocation3 + $0xb0] ss:$8 sps:$4 sm:$0xff]  }
 0x267   :  { %4170 = vmatmul.mubr.msk.bf16.gmra.mrb[40].mxu0 %vm252_vm1, %v5468_v27  ;;  %v5063_v27 = vld [vmem:[#allocation3 + $0x94] ss:$8 sps:$4 sm:$0xff]  }
 0x268   :  { %1901 = vmatprep.mubr.bf16.mxu0 %v6486_v1  ;;  %2382 = vmatprep.subr.bf16.mxu1 %v5063_v27 }
 0x269   :  { %2383 = vmatpush1.bf16.msra.mxu1 %v5061_v49  ;;  %v5072_v49 = vld [vmem:[#allocation3 + $0xc4] ss:$8 sps:$4 sm:$0xff]  }
 0x26a   :  { %2384 = vmatprep.subr.bf16.mxu1 %v5066_v51  ;;  %v5073_v51 = vld [vmem:[#allocation3 + $0xd0] ss:$8 sps:$4 sm:$0xff]  }
 0x26d   :  { %2385 = vmatpush1.bf16.msra.mxu1 %v5064_v37  ;;  %v5075_v37 = vld [vmem:[#allocation3 + $0xd4] ss:$8 sps:$4 sm:$0xff]  }
 0x26e   :  { %2386 = vmatprep.subr.bf16.mxu1 %v5069_v36 }
 0x26f   :  { %4171 = vmatmul.mubr.msk.bf16.gmra.mrb[44].mxu0 %vm252_vm1, %v5535_v35  ;;  %v5946_v35 = vpop.f32.mrb[44].mxu1 }
 0x270   :  { %1911 = vmatprep.mubr.bf16.mxu0 %v6486_v1  ;;  %v5949_v50 = vpop.f32.mrb[45].mxu1 }
 0x271   :  { %6490 = vst [vmem:[#allocation8_spill] sm:$0xff] %v5949_v50  ;;  %v5951_v52 = vpop.f32.mrb[46].mxu1  ;;  %2387 = vmatpush1.bf16.msra.mxu1 %v5067_v26  ;;  %v5070_v50 = vld [vmem:[#allocation3 + $0xc0] ss:$8 sps:$4 sm:$0xff]   ;;  %v5078_v26 = vld [vmem:[#allocation3 + $0xe4] ss:$8 sps:$4 sm:$0xff]  }
 0x272   :  { %6491 = vst [vmem:[#allocation9_spill] sm:$0xff] %v5951_v52  ;;  %v5953_v38 = vpop.f32.mrb[47].mxu1  ;;  %2388 = vmatprep.subr.bf16.mxu1 %v5072_v49  ;;  %v5079_v49 = vld [vmem:[#allocation3 + $0xf0] ss:$8 sps:$4 sm:$0xff]  }
 0x273   :  { %6492 = vst [vmem:[#allocation10_spill] sm:$0xff] %v5953_v38 }
 0x275   :  { %2389 = vmatpush1.bf16.msra.mxu1 %v5070_v50  ;;  %v5081_v50 = vld [vmem:[#allocation3 + $0xf4] ss:$8 sps:$4 sm:$0xff]  }
 0x276   :  { %2390 = vmatprep.subr.bf16.mxu1 %v5075_v37 }
 0x277   :  { %4172 = vmatmul.mubr.msk.bf16.gmra.mrb[48].mxu0 %vm252_vm1, %v5552_v39  ;;  %v5957_v39 = vpop.f32.mrb[48].mxu1 }
 0x278   :  { %1921 = vmatprep.mubr.bf16.mxu0 %v6486_v1  ;;  %v5960_v27 = vpop.f32.mrb[49].mxu1 }
 0x279   :  { %6493 = vst [vmem:[#allocation11_spill] sm:$0xff] %v5960_v27  ;;  %v5962_v52 = vpop.f32.mrb[50].mxu1  ;;  %2391 = vmatpush1.bf16.msra.mxu1 %v5073_v51  ;;  %v5076_v27 = vld [vmem:[#allocation3 + $0xe0] ss:$8 sps:$4 sm:$0xff]  }
 0x27a   :  { %6494 = vst [vmem:[#allocation12_spill] sm:$0xff] %v5962_v52  ;;  %v5964_v38 = vpop.f32.mrb[51].mxu1  ;;  %2392 = vmatprep.subr.bf16.mxu1 %v5078_v26 }
 0x27b   :  { %6495 = vst [vmem:[#allocation13_spill] sm:$0xff] %v5964_v38 }
 0x27d   :  { %2393 = vmatpush1.bf16.msra.mxu1 %v5076_v27 }
 0x27e   :  { %2394 = vmatprep.subr.bf16.mxu1 %v5081_v50 }
 0x27f   :  { %4173 = vmatmul.mubr.msk.bf16.gmra.mrb[52].mxu0 %vm252_vm1, %v5567_v40  ;;  %v5968_v40 = vpop.f32.mrb[52].mxu1 }
 0x280   :  { %1931 = vmatprep.mubr.bf16.mxu0 %v6486_v1  ;;  %v5971_v36 = vpop.f32.mrb[53].mxu1 }
 0x281   :  { %v5973_v52 = vpop.f32.mrb[54].mxu1  ;;  %2395 = vmatpush1.bf16.msra.mxu1 %v5079_v49 }
 0x282   :  { %6496 = vst [vmem:[#allocation14_spill] sm:$0xff] %v5973_v52  ;;  %v5975_v38 = vpop.f32.mrb[55].mxu1 }
 0x287   :  { %4174 = vmatmul.mubr.msk.bf16.gmra.mrb[56].mxu0 %vm252_vm1, %v5578_v41  ;;  %v5979_v41 = vpop.f32.mrb[56].mxu1 }
 0x288   :  { %1941 = vmatprep.mubr.bf16.mxu0 %v6486_v1  ;;  %v5982_v37 = vpop.f32.mrb[57].mxu1 }
 0x289   :  { %6497 = vst [vmem:[#allocation15_spill] sm:$0xff] %v5982_v37  ;;  %v5984_v51 = vpop.f32.mrb[58].mxu1 }
 0x28a   :  { %6498 = vst [vmem:[#allocation16_spill] sm:$0xff] %v5984_v51  ;;  %v5986_v52 = vpop.f32.mrb[59].mxu1 }
 0x28b   :  { %6499 = vst [vmem:[#allocation17_spill] sm:$0xff] %v5986_v52  ;;  %v5990_v27 = vpop.f32.mrb[60].mxu1 }
 0x28c   :  { %6500 = vst [vmem:[#allocation18_spill] sm:$0xff] %v5990_v27  ;;  %v5993_v26 = vpop.f32.mrb[61].mxu1 }
 0x28d   :  { %6501 = vst [vmem:[#allocation19_spill] sm:$0xff] %v5993_v26 }
 0x28f   :  { %4175 = vmatmul.mubr.msk.bf16.gmra.mrb[60].mxu0 %vm252_vm1, %v5589_v42  ;;  %v5995_v42 = vpop.f32.mrb[62].mxu1 }
 0x290   :  { %1951 = vmatprep.mubr.bf16.mxu0 %v6486_v1  ;;  %6502 = vst [vmem:[#allocation20_spill] sm:$0xff] %v5995_v42  ;;  %v5997_v50 = vpop.f32.mrb[63].mxu1 }
 0x291   :  { %6503 = vst [vmem:[#allocation21_spill] sm:$0xff] %v5997_v50  ;;  %v6001_v49 = vpop.f32.mrb[64].mxu1 }
 0x292   :  { %6504 = vst [vmem:[#allocation22_spill] sm:$0xff] %v6001_v49  ;;  %v6004_v52 = vpop.f32.mrb[65].mxu1 }
 0x293   :  { %6505 = vst [vmem:[#allocation23_spill] sm:$0xff] %v6004_v52 }
 0x297   :  { %4176 = vmatmul.mubr.msk.bf16.gmra.mrb[64].mxu0 %vm252_vm1, %v5600_v43  ;;  %v6006_v43 = vpop.f32.mrb[66].mxu1 }
 0x298   :  { %1961 = vmatprep.mubr.bf16.mxu0 %v6486_v1  ;;  %6506 = vst [vmem:[#allocation24_spill] sm:$0xff] %v6006_v43  ;;  %v6008_v27 = vpop.f32.mrb[67].mxu1 }
 0x299   :  { %6507 = vst [vmem:[#allocation25_spill] sm:$0xff] %v6008_v27  ;;  %v6012_v26 = vpop.f32.mrb[68].mxu1 }
 0x29a   :  { %6508 = vst [vmem:[#allocation26_spill] sm:$0xff] %v6012_v26  ;;  %v6015_v50 = vpop.f32.mrb[69].mxu1 }
 0x29b   :  { %6509 = vst [vmem:[#allocation27_spill] sm:$0xff] %v6015_v50 }
 0x29f   :  { %4177 = vmatmul.mubr.msk.bf16.gmra.mrb[68].mxu0 %vm252_vm1, %v5611_v44  ;;  %v6017_v44 = vpop.f32.mrb[70].mxu1 }
 0x2a0   :  { %1971 = vmatprep.mubr.bf16.mxu0 %v6486_v1  ;;  %6510 = vst [vmem:[#allocation28_spill] sm:$0xff] %v6017_v44  ;;  %v6019_v49 = vpop.f32.mrb[71].mxu1 }
 0x2a1   :  { %6511 = vst [vmem:[#allocation29_spill] sm:$0xff] %v6019_v49  ;;  %v6023_v52 = vpop.f32.mrb[72].mxu1 }
 0x2a2   :  { %6512 = vst [vmem:[#allocation30_spill] sm:$0xff] %v6023_v52  ;;  %v6026_v27 = vpop.f32.mrb[73].mxu1 }
 0x2a3   :  { %6513 = vst [vmem:[#allocation31_spill] sm:$0xff] %v6026_v27 }
 0x2a7   :  { %4178 = vmatmul.mubr.msk.bf16.gmra.mrb[72].mxu0 %vm252_vm1, %v5622_v45  ;;  %v6028_v45 = vpop.f32.mrb[74].mxu1 }
 0x2a8   :  { %1981 = vmatprep.mubr.bf16.mxu0 %v6486_v1  ;;  %6514 = vst [vmem:[#allocation32_spill] sm:$0xff] %v6028_v45  ;;  %v6030_v26 = vpop.f32.mrb[75].mxu1 }
 0x2a9   :  { %6515 = vst [vmem:[#allocation33_spill] sm:$0xff] %v6030_v26  ;;  %v6034_v50 = vpop.f32.mrb[76].mxu1 }
 0x2aa   :  { %6516 = vst [vmem:[#allocation34_spill] sm:$0xff] %v6034_v50  ;;  %v6037_v49 = vpop.f32.mrb[77].mxu1 }
 0x2ab   :  { %6517 = vst [vmem:[#allocation35_spill] sm:$0xff] %v6037_v49 }
 0x2af   :  { %4179 = vmatmul.mubr.msk.bf16.gmra.mrb[76].mxu0 %vm252_vm1, %v5633_v46  ;;  %v6039_v46 = vpop.f32.mrb[78].mxu1 }
 0x2b0   :  { %1991 = vmatprep.mubr.bf16.mxu0 %v6486_v1  ;;  %6518 = vst [vmem:[#allocation36_spill] sm:$0xff] %v6039_v46  ;;  %v6041_v52 = vpop.f32.mrb[79].mxu1 }
 0x2b1   :  { %6519 = vst [vmem:[#allocation37_spill] sm:$0xff] %v6041_v52  ;;  %v6045_v27 = vpop.f32.mrb[80].mxu1 }
 0x2b2   :  { %6520 = vst [vmem:[#allocation38_spill] sm:$0xff] %v6045_v27  ;;  %v6048_v26 = vpop.f32.mrb[81].mxu1 }
 0x2b3   :  { %6521 = vst [vmem:[#allocation39_spill] sm:$0xff] %v6048_v26  ;;  %v5057_v26 = vld [vmem:[%s6476_s0 + $0xd8] sm:$0xff]  }
 0x2b7   :  { %4180 = vmatmul.mubr.msk.bf16.gmra.mrb[80].mxu0 %vm252_vm1, %v5644_v47  ;;  %v6050_v47 = vpop.f32.mrb[82].mxu1 }
 0x2b8   :  { %2001 = vmatprep.mubr.bf16.mxu0 %v6486_v1  ;;  %6522 = vst [vmem:[#allocation40_spill] sm:$0xff] %v6050_v47  ;;  %v6052_v50 = vpop.f32.mrb[83].mxu1  ;;  %v5084_v47 = vld [vmem:[#allocation3 + $0x4] ss:$8 sps:$4 sm:$0xff]  }
 0x2b9   :  { %6523 = vst [vmem:[#allocation41_spill] sm:$0xff] %v6052_v50  ;;  %v6056_v49 = vpop.f32.mrb[84].mxu1  ;;  %2573 = vmatprep.subr.bf16.mxu1 %v5084_v47 }
 0x2ba   :  { %6524 = vst [vmem:[#allocation42_spill] sm:$0xff] %v6056_v49  ;;  %v6059_v52 = vpop.f32.mrb[85].mxu1 }
 0x2bb   :  { %6525 = vst [vmem:[#allocation43_spill] sm:$0xff] %v6059_v52 }
 0x2bf   :  { %4181 = vmatmul.mubr.msk.bf16.gmra.mrb[84].mxu0 %vm252_vm1, %v5655_v48  ;;  %v6061_v48 = vpop.f32.mrb[86].mxu1 }
 0x2c0   :  { %2011 = vmatprep.mubr.bf16.mxu0 %v6486_v1  ;;  %6526 = vst [vmem:[#allocation44_spill] sm:$0xff] %v6061_v48  ;;  %v6063_v27 = vpop.f32.mrb[87].mxu1 }
 0x2c1   :  { %6527 = vst [vmem:[#allocation45_spill] sm:$0xff] %v6063_v27  ;;  %v6069_v50 = vpop.f32.mrb[88].mxu1 }
 0x2c2   :  { %6528 = vst [vmem:[#allocation46_spill] sm:$0xff] %v6069_v50 }
 0x2c7   :  { %4182 = vmatmul.mubr.msk.bf16.gmra.mrb[88].mxu0 %vm252_vm1, %v5815_v53  ;;  %v6071_v53 = vpop.f32.mrb[89].mxu1 }
 0x2c8   :  { %2021 = vmatprep.mubr.bf16.mxu0 %v6486_v1  ;;  %6529 = vst [vmem:[#allocation47_spill] sm:$0xff] %v6071_v53  ;;  %v6073_v49 = vpop.f32.mrb[90].mxu1 }
 0x2c9   :  { %6530 = vst [vmem:[#allocation48_spill] sm:$0xff] %v6073_v49  ;;  %v6075_v1 = vpop.f32.mrb[91].mxu1 }
 0x2ca   :  { %6531 = vst [vmem:[#allocation49_spill] sm:$0xff] %v6075_v1  ;;  %v6077_v52 = vpop.f32.mrb[92].mxu1 }
 0x2cb   :  { %6532 = vst [vmem:[#allocation50_spill] sm:$0xff] %v6077_v52  ;;  %v6079_v48 = vpop.f32.mrb[93].mxu1 }
 0x2cc   :  { %6533 = vst [vmem:[#allocation51_spill] sm:$0xff] %v6079_v48  ;;  %v6081_v27 = vpop.f32.mrb[94].mxu1 }
 0x2cd   :  { %6534 = vst [vmem:[#allocation52_spill] sm:$0xff] %v6081_v27  ;;  %v6083_v46 = vpop.f32.mrb[95].mxu1 }
 0x2ce   :  { %6535 = vst [vmem:[#allocation53_spill] sm:$0xff] %v6083_v46 }
 0x2cf   :  { %4183 = vmatmul.mubr.msk.bf16.gmra.mrb[92].mxu0 %vm252_vm1, %v5057_v26 }
 0x2ea   :  { %v1793_v45 = vpop.f32.mrb[0].mxu0 }
 0x2eb   :  { %v4480_v26 = vadd.f32 %v1793_v45, %v5823_v54  ;;  %v1795_v50 = vpop.f32.mrb[1].mxu0 }
 0x2ec   :  { %v4481_v44 = vadd.f32 %v1795_v50, %v5827_v55  ;;  %v1797_v53 = vpop.f32.mrb[2].mxu0 }
 0x2ed   :  { %v4482_v49 = vadd.f32 %v1797_v53, %v5830_v56  ;;  %v1799_v47 = vpop.f32.mrb[3].mxu0  ;;  %v6096_v56 = vld [vmem:[%s6478_s2] ss:$0 sm:$0xff] }
 0x2ee   :  { %v2128_v43 = vmax.f32 %v4480_v26, %v4481_v44  ;;  %v4483_v1 = vadd.f32 %v1799_v47, %v5832_v57 }
 0x2f0   :  { %v2129_v52 = vmax.f32 %v4482_v49, %v4483_v1 }
 0x2f2   :  { %v1803_v42 = vpop.f32.mrb[4].mxu0 }
 0x2f3   :  { %v4484_v48 = vadd.f32 %v1803_v42, %v5834_v58  ;;  %v1805_v27 = vpop.f32.mrb[5].mxu0 }
 0x2f4   :  { %v4485_v46 = vadd.f32 %v1805_v27, %v5838_v59  ;;  %v1807_v51 = vpop.f32.mrb[6].mxu0 }
 0x2f5   :  { %v4486_v54 = vadd.f32 %v1807_v51, %v5841_v60  ;;  %v1809_v45 = vpop.f32.mrb[7].mxu0 }
 0x2f6   :  { %v2130_v37 = vmax.f32 %v4484_v48, %v4485_v46  ;;  %v4487_v55 = vadd.f32 %v1809_v45, %v5843_v61 }
 0x2f8   :  { %v2176_v57 = vmax.f32 %v2128_v43, %v2130_v37  ;;  %v2131_v1 = vmax.f32 %v4486_v54, %v4487_v55 }
 0x2fa   :  { %v2207_v50 = vadd.f32 %v6096_v56, %v2176_v57  ;;  %v2177_v58 = vmax.f32 %v2129_v52, %v2131_v1  ;;  %v1813_v42 = vpop.f32.mrb[8].mxu0 }
 0x2fb   :  { %v4488_v59 = vadd.f32 %v1813_v42, %v5845_v62  ;;  %v1815_v27 = vpop.f32.mrb[9].mxu0 }
 0x2fc   :  { %v2208_v60 = vadd.f32 %v6096_v56, %v2177_v58  ;;  %v4489_v51 = vadd.f32 %v1815_v27, %v5849_v63  ;;  %v1817_v49 = vpop.f32.mrb[10].mxu0  ;;  %v2231_v46 = vmax.f32 %v2207_v50, 0.0 }
 0x2fd   :  { %v4490_v61 = vadd.f32 %v1817_v49, %v5852_v0  ;;  %v1819_v44 = vpop.f32.mrb[11].mxu0 }
 0x2fe   :  { %v2232_v48 = vmax.f32 %v2208_v60, 0.0  ;;  %v2132_v53 = vmax.f32 %v4488_v59, %v4489_v51  ;;  %v4491_v37 = vadd.f32 %v1819_v44, %v5854_v2 }
 0x300   :  { %v6104_v43 = vpack.c.bf16 %v2232_v48, %v2231_v46  ;;  %v2133_v52 = vmax.f32 %v4490_v61, %v4491_v37  ;;  %v5082_v46 = vld [vmem:[#allocation3] ss:$8 sps:$4 sm:$0xff]   ;;  %v5087_v37 = vld [vmem:[#allocation3 + $0x14] ss:$8 sps:$4 sm:$0xff]  }
 0x302   :  { %v1823_v26 = vpop.f32.mrb[12].mxu0 }
 0x303   :  { %v4492_v62 = vadd.f32 %v1823_v26, %v5856_v3  ;;  %v1825_v47 = vpop.f32.mrb[13].mxu0  ;;  %v6536_v26 = vmov 0  }
 0x304   :  { %v4493_v54 = vadd.f32 %v1825_v47, %v5860_v4  ;;  %v1827_v45 = vpop.f32.mrb[14].mxu0 }
 0x305   :  { %v4494_v63 = vadd.f32 %v1827_v45, %v5863_v5  ;;  %v1829_v55 = vpop.f32.mrb[15].mxu0 }
 0x306   :  { %v2134_v0 = vmax.f32 %v4492_v62, %v4493_v54  ;;  %v4495_v57 = vadd.f32 %v1829_v55, %v5865_v6 }
 0x308   :  { %v2178_v1 = vmax.f32 %v2132_v53, %v2134_v0  ;;  %v2135_v50 = vmax.f32 %v4494_v63, %v4495_v57  ;;  %v5088_v0 = vld [vmem:[#allocation3 + $0x20] ss:$8 sps:$4 sm:$0xff]  }
 0x30a   :  { %v2209_v2 = vadd.f32 %v6096_v56, %v2178_v1  ;;  %v2179_v58 = vmax.f32 %v2133_v52, %v2135_v50  ;;  %v1833_v42 = vpop.f32.mrb[16].mxu0  ;;  %v5093_v1 = vld [vmem:[#allocation3 + $0x34] ss:$8 sps:$4 sm:$0xff]  }
 0x30b   :  { %v4496_v59 = vadd.f32 %v1833_v42, %v5867_v7  ;;  %v1835_v27 = vpop.f32.mrb[17].mxu0 }
 0x30c   :  { %v2210_v3 = vadd.f32 %v6096_v56, %v2179_v58  ;;  %v4497_v4 = vadd.f32 %v1835_v27, %v5871_v8  ;;  %v1837_v60 = vpop.f32.mrb[18].mxu0  ;;  %v2233_v49 = vmax.f32 %v2209_v2, 0.0 }
 0x30d   :  { %v4498_v5 = vadd.f32 %v1837_v60, %v5874_v9  ;;  %v1839_v51 = vpop.f32.mrb[19].mxu0  ;;  %v5085_v9 = vld [vmem:[#allocation3 + $0x10] ss:$8 sps:$4 sm:$0xff]  }
 0x30e   :  { %v2234_v61 = vmax.f32 %v2210_v3, 0.0  ;;  %v2136_v6 = vmax.f32 %v4496_v59, %v4497_v4  ;;  %v4499_v44 = vadd.f32 %v1839_v51, %v5876_v10  ;;  %v5090_v10 = vld [vmem:[#allocation3 + $0x24] ss:$8 sps:$4 sm:$0xff]   ;;  %v5091_v59 = vld [vmem:[#allocation3 + $0x30] ss:$8 sps:$4 sm:$0xff]  }
 0x30f   :  { %v5096_v3 = vld [vmem:[#allocation3 + $0x44] ss:$8 sps:$4 sm:$0xff]  }
 0x310   :  { %v6116_v48 = vpack.c.bf16 %v2234_v61, %v2233_v49  ;;  %v2137_v53 = vmax.f32 %v4498_v5, %v4499_v44 }
 0x312   :  { %v1843_v7 = vpop.f32.mrb[20].mxu0  ;;  %2413 = vmatmul.mubr.bf16.vlgmr.msra.gmra.mrb[96].mxu1 %v6116_v48 }
 0x313   :  { %v4500_v52 = vadd.f32 %v1843_v7, %v5878_v11  ;;  %v1845_v8 = vpop.f32.mrb[21].mxu0  ;;  %2422 = vmatprep.mubr.bf16.mxu1 %v6536_v26  ;;  %2574 = vmatpush1.bf16.msra.mxu1 %v5082_v46 }
 0x314   :  { %v4501_v62 = vadd.f32 %v1845_v8, %v5882_v12  ;;  %v1847_v47 = vpop.f32.mrb[22].mxu0  ;;  %2575 = vmatprep.subr.bf16.mxu1 %v5087_v37 }
 0x315   :  { %v4502_v54 = vadd.f32 %v1847_v47, %v5885_v13  ;;  %v1849_v45 = vpop.f32.mrb[23].mxu0 }
 0x316   :  { %v2138_v63 = vmax.f32 %v4500_v52, %v4501_v62  ;;  %v4503_v55 = vadd.f32 %v1849_v45, %v5887_v14  ;;  %v5102_v52 = vld [vmem:[#allocation3 + $0x64] ss:$8 sps:$4 sm:$0xff]   ;;  %v5105_v45 = vld [vmem:[#allocation3 + $0x74] ss:$8 sps:$4 sm:$0xff]  }
 0x317   :  { %2576 = vmatpush1.bf16.msra.mxu1 %v5085_v9 }
 0x318   :  { %v2180_v57 = vmax.f32 %v2136_v6, %v2138_v63  ;;  %v2139_v11 = vmax.f32 %v4502_v54, %v4503_v55  ;;  %2577 = vmatprep.subr.bf16.mxu1 %v5090_v10  ;;  %v5100_v10 = vld [vmem:[#allocation3 + $0x60] ss:$8 sps:$4 sm:$0xff]  }
 0x31a   :  { %v2181_v50 = vmax.f32 %v2137_v53, %v2139_v11  ;;  %v1853_v2 = vpop.f32.mrb[24].mxu0  ;;  %v2211_v58 = vadd.f32 %v6096_v56, %v2180_v57  ;;  %v5103_v11 = vld [vmem:[#allocation3 + $0x70] ss:$8 sps:$4 sm:$0xff]  }
 0x31b   :  { %v4504_v12 = vadd.f32 %v1853_v2, %v5889_v15  ;;  %v1855_v42 = vpop.f32.mrb[25].mxu0  ;;  %2578 = vmatpush1.bf16.msra.mxu1 %v5088_v0  ;;  %v5094_v15 = vld [vmem:[#allocation3 + $0x40] ss:$8 sps:$4 sm:$0xff]  }
 0x31c   :  { %v4505_v13 = vadd.f32 %v1855_v42, %v5893_v16  ;;  %v1857_v27 = vpop.f32.mrb[26].mxu0  ;;  %v2212_v14 = vadd.f32 %v6096_v56, %v2181_v50  ;;  %2579 = vmatprep.subr.bf16.mxu1 %v5093_v1  ;;  %v2235_v49 = vmax.f32 %v2211_v58, 0.0  ;;  %v5099_v16 = vld [vmem:[#allocation3 + $0x54] ss:$8 sps:$4 sm:$0xff]   ;;  %v5108_v50 = vld [vmem:[#allocation3 + $0x104] ss:$8 sps:$4 sm:$0xff]  }
 0x31d   :  { %v4506_v4 = vadd.f32 %v1857_v27, %v5896_v17  ;;  %v1859_v60 = vpop.f32.mrb[27].mxu0  ;;  %v5097_v17 = vld [vmem:[#allocation3 + $0x50] ss:$8 sps:$4 sm:$0xff]  }
 0x31e   :  { %v2140_v5 = vmax.f32 %v4504_v12, %v4505_v13  ;;  %v4507_v51 = vadd.f32 %v1859_v60, %v5898_v18  ;;  %v2236_v61 = vmax.f32 %v2212_v14, 0.0 }
 0x31f   :  { %2580 = vmatpush1.bf16.msra.mxu1 %v5091_v59 }
 0x320   :  { %v2141_v6 = vmax.f32 %v4506_v4, %v4507_v51  ;;  %v6130_v44 = vpack.c.bf16 %v2236_v61, %v2235_v49  ;;  %2581 = vmatprep.subr.bf16.mxu1 %v5096_v3 }
 0x322   :  { %v1863_v46 = vpop.f32.mrb[28].mxu0  ;;  %2423 = vmatmul.mubr.bf16.gmra.mrb[100].mxu1 %v6130_v44 }
 0x323   :  { %v4508_v53 = vadd.f32 %v1863_v46, %v5900_v19  ;;  %v1865_v37 = vpop.f32.mrb[29].mxu0  ;;  %2432 = vmatprep.mubr.bf16.mxu1 %v6536_v26  ;;  %2582 = vmatpush1.bf16.msra.mxu1 %v5094_v15 }
 0x324   :  { %v4509_v18 = vadd.f32 %v1865_v37, %v5902_v20  ;;  %v1867_v7 = vpop.f32.mrb[30].mxu0  ;;  %2583 = vmatprep.subr.bf16.mxu1 %v5099_v16 }
 0x325   :  { %v4510_v8 = vadd.f32 %v1867_v7, %v5904_v21  ;;  %v1869_v9 = vpop.f32.mrb[31].mxu0 }
 0x326   :  { %v2142_v62 = vmax.f32 %v4508_v53, %v4509_v18  ;;  %v4511_v47 = vadd.f32 %v1869_v9, %v5906_v22 }
 0x327   :  { %2584 = vmatpush1.bf16.msra.mxu1 %v5097_v17  ;;  %v6537_v17 = vld [vmem:[#allocation6_spill] sm:$0xff] }
 0x328   :  { %v2182_v54 = vmax.f32 %v2140_v5, %v2142_v62  ;;  %v2143_v19 = vmax.f32 %v4510_v8, %v4511_v47  ;;  %2585 = vmatprep.subr.bf16.mxu1 %v5102_v52  ;;  %v6538_v8 = vld [vmem:[#allocation7_spill] sm:$0xff] }
 0x32a   :  { %v2213_v63 = vadd.f32 %v6096_v56, %v2182_v54  ;;  %v2183_v55 = vmax.f32 %v2141_v6, %v2143_v19  ;;  %v1873_v0 = vpop.f32.mrb[32].mxu0 }
 0x32b   :  { %v4512_v20 = vadd.f32 %v1873_v0, %v5908_v23  ;;  %v1875_v57 = vpop.f32.mrb[33].mxu0  ;;  %2586 = vmatpush1.bf16.msra.mxu1 %v5100_v10 }
 0x32c   :  { %v2214_v21 = vadd.f32 %v6096_v56, %v2183_v55  ;;  %v4513_v1 = vadd.f32 %v1875_v57, %v5912_v24  ;;  %v1877_v22 = vpop.f32.mrb[34].mxu0  ;;  %2587 = vmatprep.subr.bf16.mxu1 %v5105_v45  ;;  %v2237_v12 = vmax.f32 %v2213_v63, 0.0  ;;  %v6540_v63 = vld [vmem:[#allocation9_spill] sm:$0xff]  ;;  %v6541_v57 = vld [vmem:[#allocation10_spill] sm:$0xff] }
 0x32d   :  { %v4514_v2 = vadd.f32 %v1877_v22, %v5915_v28  ;;  %v1879_v58 = vpop.f32.mrb[35].mxu0 }
 0x32e   :  { %v2238_v42 = vmax.f32 %v2214_v21, 0.0  ;;  %v2144_v59 = vmax.f32 %v4512_v20, %v4513_v1  ;;  %v4515_v13 = vadd.f32 %v1879_v58, %v5917_v29 }
 0x32f   :  { %2588 = vmatpush1.bf16.msra.mxu1 %v5103_v11 }
 0x330   :  { %v2145_v23 = vmax.f32 %v4514_v2, %v4515_v13  ;;  %v6144_v27 = vpack.c.bf16 %v2238_v42, %v2237_v12  ;;  %2783 = vmatprep.subr.bf16.mxu1 %v5108_v50  ;;  %v6542_v42 = vld [vmem:[#allocation11_spill] sm:$0xff] }
 0x332   :  { %v1883_v14 = vpop.f32.mrb[36].mxu0  ;;  %2433 = vmatmul.mubr.bf16.gmra.mrb[104].mxu1 %v6144_v27 }
 0x333   :  { %v4516_v24 = vadd.f32 %v1883_v14, %v5919_v30  ;;  %v1885_v3 = vpop.f32.mrb[37].mxu0  ;;  %2442 = vmatprep.mubr.bf16.mxu1 %v6536_v26 }
 0x334   :  { %v4517_v28 = vadd.f32 %v1885_v3, %v5921_v31  ;;  %v1887_v4 = vpop.f32.mrb[38].mxu0 }
 0x335   :  { %v4518_v60 = vadd.f32 %v1887_v4, %v5923_v32  ;;  %v1889_v5 = vpop.f32.mrb[39].mxu0 }
 0x336   :  { %v2146_v29 = vmax.f32 %v4516_v24, %v4517_v28  ;;  %v4519_v51 = vadd.f32 %v1889_v5, %v5925_v33 }
 0x338   :  { %v2184_v49 = vmax.f32 %v2144_v59, %v2146_v29  ;;  %v2147_v61 = vmax.f32 %v4518_v60, %v4519_v51  ;;  %v6544_v60 = vld [vmem:[#allocation13_spill] sm:$0xff] }
 0x33a   :  { %v2215_v15 = vadd.f32 %v6096_v56, %v2184_v49  ;;  %v2185_v6 = vmax.f32 %v2145_v23, %v2147_v61  ;;  %v1893_v16 = vpop.f32.mrb[40].mxu0  ;;  %v6543_v23 = vld [vmem:[#allocation12_spill] sm:$0xff] }
 0x33b   :  { %v4520_v30 = vadd.f32 %v1893_v16, %v5935_v25  ;;  %v1895_v46 = vpop.f32.mrb[41].mxu0  ;;  %v6545_v16 = vld [vmem:[#allocation14_spill] sm:$0xff] }
 0x33c   :  { %v2216_v53 = vadd.f32 %v6096_v56, %v2185_v6  ;;  %v4521_v31 = vadd.f32 %v1895_v46, %v5938_v34  ;;  %v1897_v37 = vpop.f32.mrb[42].mxu0  ;;  %v2239_v7 = vmax.f32 %v2215_v15, 0.0  ;;  %v6539_v34 = vld [vmem:[#allocation8_spill] sm:$0xff] }
 0x33d   :  { %v4522_v32 = vadd.f32 %v1897_v37, %v6537_v17  ;;  %v1899_v18 = vpop.f32.mrb[43].mxu0 }
 0x33e   :  { %v2240_v52 = vmax.f32 %v2216_v53, 0.0  ;;  %v2148_v33 = vmax.f32 %v4520_v30, %v4521_v31  ;;  %v4523_v9 = vadd.f32 %v1899_v18, %v6538_v8  ;;  %v6546_v8 = vld [vmem:[#allocation15_spill] sm:$0xff] }
 0x340   :  { %v6158_v62 = vpack.c.bf16 %v2240_v52, %v2239_v7  ;;  %v2149_v47 = vmax.f32 %v4522_v32, %v4523_v9 }
 0x342   :  { %v1903_v10 = vpop.f32.mrb[44].mxu0  ;;  %2443 = vmatmul.mubr.bf16.gmra.mrb[108].mxu1 %v6158_v62 }
 0x343   :  { %v4524_v25 = vadd.f32 %v1903_v10, %v5946_v35  ;;  %v1905_v54 = vpop.f32.mrb[45].mxu0  ;;  %2452 = vmatprep.mubr.bf16.mxu1 %v6536_v26 }
 0x344   :  { %v4525_v19 = vadd.f32 %v1905_v54, %v6539_v34  ;;  %v1907_v45 = vpop.f32.mrb[46].mxu0 }
 0x345   :  { %v4526_v55 = vadd.f32 %v1907_v45, %v6540_v63  ;;  %v1909_v0 = vpop.f32.mrb[47].mxu0 }
 0x346   :  { %v2150_v20 = vmax.f32 %v4524_v25, %v4525_v19  ;;  %v4527_v11 = vadd.f32 %v1909_v0, %v6541_v57  ;;  %v6548_v19 = vld [vmem:[#allocation17_spill] sm:$0xff] }
 0x348   :  { %v2186_v21 = vmax.f32 %v2148_v33, %v2150_v20  ;;  %v2151_v1 = vmax.f32 %v4526_v55, %v4527_v11  ;;  %v6550_v11 = vld [vmem:[#allocation19_spill] sm:$0xff] }
 0x34a   :  { %v2217_v22 = vadd.f32 %v6096_v56, %v2186_v21  ;;  %v2187_v50 = vmax.f32 %v2149_v47, %v2151_v1  ;;  %v1913_v2 = vpop.f32.mrb[48].mxu0  ;;  %v6547_v47 = vld [vmem:[#allocation16_spill] sm:$0xff] }
 0x34b   :  { %v4528_v35 = vadd.f32 %v1913_v2, %v5957_v39  ;;  %v1915_v58 = vpop.f32.mrb[49].mxu0 }
 0x34c   :  { %v2218_v12 = vadd.f32 %v6096_v56, %v2187_v50  ;;  %v4529_v59 = vadd.f32 %v1915_v58, %v6542_v42  ;;  %v1917_v13 = vpop.f32.mrb[50].mxu0  ;;  %v2241_v3 = vmax.f32 %v2217_v22, 0.0  ;;  %v6551_v22 = vld [vmem:[#allocation20_spill] sm:$0xff]  ;;  %v6552_v58 = vld [vmem:[#allocation21_spill] sm:$0xff] }
 0x34d   :  { %v4530_v14 = vadd.f32 %v1917_v13, %v6543_v23  ;;  %v1919_v24 = vpop.f32.mrb[51].mxu0 }
 0x34e   :  { %v2242_v28 = vmax.f32 %v2218_v12, 0.0  ;;  %v2152_v4 = vmax.f32 %v4528_v35, %v4529_v59  ;;  %v4531_v5 = vadd.f32 %v1919_v24, %v6544_v60  ;;  %v6553_v24 = vld [vmem:[#allocation22_spill] sm:$0xff]  ;;  %v6554_v60 = vld [vmem:[#allocation23_spill] sm:$0xff] }
 0x350   :  { %v6172_v29 = vpack.c.bf16 %v2242_v28, %v2241_v3  ;;  %v2153_v51 = vmax.f32 %v4530_v14, %v4531_v5 }
 0x352   :  { %v1923_v49 = vpop.f32.mrb[52].mxu0  ;;  %2453 = vmatmul.mubr.bf16.gmra.mrb[112].mxu1 %v6172_v29 }
 0x353   :  { %v4532_v39 = vadd.f32 %v1923_v49, %v5968_v40  ;;  %v1925_v61 = vpop.f32.mrb[53].mxu0  ;;  %2462 = vmatprep.mubr.bf16.mxu1 %v6536_v26  ;;  %v6555_v49 = vld [vmem:[#allocation24_spill] sm:$0xff] }
 0x354   :  { %v4533_v15 = vadd.f32 %v1925_v61, %v5971_v36  ;;  %v1927_v6 = vpop.f32.mrb[54].mxu0 }
 0x355   :  { %v4534_v30 = vadd.f32 %v1927_v6, %v6545_v16  ;;  %v1929_v46 = vpop.f32.mrb[55].mxu0 }
 0x356   :  { %v2154_v53 = vmax.f32 %v4532_v39, %v4533_v15  ;;  %v4535_v31 = vadd.f32 %v1929_v46, %v5975_v38 }
 0x358   :  { %v2188_v37 = vmax.f32 %v2152_v4, %v2154_v53  ;;  %v2155_v17 = vmax.f32 %v4534_v30, %v4535_v31  ;;  %v6556_v30 = vld [vmem:[#allocation25_spill] sm:$0xff] }
 0x35a   :  { %v2219_v32 = vadd.f32 %v6096_v56, %v2188_v37  ;;  %v2189_v18 = vmax.f32 %v2153_v51, %v2155_v17  ;;  %v1933_v7 = vpop.f32.mrb[56].mxu0  ;;  %v6557_v17 = vld [vmem:[#allocation26_spill] sm:$0xff] }
 0x35b   :  { %v4536_v40 = vadd.f32 %v1933_v7, %v5979_v41  ;;  %v1935_v52 = vpop.f32.mrb[57].mxu0  ;;  %v6549_v41 = vld [vmem:[#allocation18_spill] sm:$0xff]  ;;  %v6558_v7 = vld [vmem:[#allocation27_spill] sm:$0xff] }
 0x35c   :  { %v2220_v33 = vadd.f32 %v6096_v56, %v2189_v18  ;;  %v4537_v36 = vadd.f32 %v1935_v52, %v6546_v8  ;;  %v1937_v9 = vpop.f32.mrb[58].mxu0  ;;  %v2243_v54 = vmax.f32 %v2219_v32, 0.0 }
 0x35d   :  { %v4538_v10 = vadd.f32 %v1937_v9, %v6547_v47  ;;  %v1939_v25 = vpop.f32.mrb[59].mxu0  ;;  %v6560_v47 = vld [vmem:[#allocation29_spill] sm:$0xff] }
 0x35e   :  { %v2244_v34 = vmax.f32 %v2220_v33, 0.0  ;;  %v2156_v38 = vmax.f32 %v4536_v40, %v4537_v36  ;;  %v4539_v45 = vadd.f32 %v1939_v25, %v6548_v19  ;;  %v6559_v33 = vld [vmem:[#allocation28_spill] sm:$0xff] }
 0x360   :  { %v6186_v63 = vpack.c.bf16 %v2244_v34, %v2243_v54  ;;  %v2157_v55 = vmax.f32 %v4538_v10, %v4539_v45  ;;  %v6561_v45 = vld [vmem:[#allocation30_spill] sm:$0xff] }
 0x362   :  { %v1943_v0 = vpop.f32.mrb[60].mxu0  ;;  %2463 = vmatmul.mubr.bf16.gmra.mrb[116].mxu1 %v6186_v63 }
 0x363   :  { %v4540_v20 = vadd.f32 %v1943_v0, %v6549_v41  ;;  %v1945_v57 = vpop.f32.mrb[61].mxu0  ;;  %2472 = vmatprep.mubr.bf16.mxu1 %v6536_v26 }
 0x364   :  { %v4541_v21 = vadd.f32 %v1945_v57, %v6550_v11  ;;  %v1947_v1 = vpop.f32.mrb[62].mxu0 }
 0x365   :  { %v4542_v50 = vadd.f32 %v1947_v1, %v6551_v22  ;;  %v1949_v2 = vpop.f32.mrb[63].mxu0 }
 0x366   :  { %v2158_v35 = vmax.f32 %v4540_v20, %v4541_v21  ;;  %v4543_v12 = vadd.f32 %v1949_v2, %v6552_v58  ;;  %v6562_v20 = vld [vmem:[#allocation31_spill] sm:$0xff]  ;;  %v6563_v21 = vld [vmem:[#allocation32_spill] sm:$0xff]  ;;  %v6564_v58 = vld [vmem:[#allocation33_spill] sm:$0xff] }
 0x368   :  { %v2190_v42 = vmax.f32 %v2156_v38, %v2158_v35  ;;  %v2159_v59 = vmax.f32 %v4542_v50, %v4543_v12 }
 0x36a   :  { %v2221_v13 = vadd.f32 %v6096_v56, %v2190_v42  ;;  %v2191_v23 = vmax.f32 %v2157_v55, %v2159_v59  ;;  %v1953_v14 = vpop.f32.mrb[64].mxu0 }
 0x36b   :  { %v4544_v3 = vadd.f32 %v1953_v14, %v6553_v24  ;;  %v1955_v28 = vpop.f32.mrb[65].mxu0 }
 0x36c   :  { %v2222_v4 = vadd.f32 %v6096_v56, %v2191_v23  ;;  %v4545_v5 = vadd.f32 %v1955_v28, %v6554_v60  ;;  %v1957_v51 = vpop.f32.mrb[66].mxu0  ;;  %v2245_v15 = vmax.f32 %v2221_v13, 0.0  ;;  %v6565_v23 = vld [vmem:[#allocation34_spill] sm:$0xff]  ;;  %v6567_v60 = vld [vmem:[#allocation36_spill] sm:$0xff] }
 0x36d   :  { %v4546_v39 = vadd.f32 %v1957_v51, %v6555_v49  ;;  %v1959_v61 = vpop.f32.mrb[67].mxu0 }
 0x36e   :  { %v2246_v6 = vmax.f32 %v2222_v4, 0.0  ;;  %v2160_v16 = vmax.f32 %v4544_v3, %v4545_v5  ;;  %v4547_v46 = vadd.f32 %v1959_v61, %v6556_v30  ;;  %v6566_v3 = vld [vmem:[#allocation35_spill] sm:$0xff]  ;;  %v5111_v30 = vld [vmem:[#allocation3 + $0x114] ss:$8 sps:$4 sm:$0xff]  }
 0x370   :  { %v6200_v53 = vpack.c.bf16 %v2246_v6, %v2245_v15  ;;  %v2161_v31 = vmax.f32 %v4546_v39, %v4547_v46  ;;  %v6568_v39 = vld [vmem:[#allocation37_spill] sm:$0xff]  ;;  %v5106_v15 = vld [vmem:[#allocation3 + $0x100] ss:$8 sps:$4 sm:$0xff]  }
 0x372   :  { %v1963_v37 = vpop.f32.mrb[68].mxu0  ;;  %2473 = vmatmul.mubr.bf16.gmra.mrb[120].mxu1 %v6200_v53 }
 0x373   :  { %v4548_v32 = vadd.f32 %v1963_v37, %v6557_v17  ;;  %v1965_v18 = vpop.f32.mrb[69].mxu0  ;;  %2482 = vmatprep.mubr.bf16.mxu1 %v6536_v26  ;;  %v6569_v17 = vld [vmem:[#allocation38_spill] sm:$0xff] }
 0x374   :  { %v4549_v40 = vadd.f32 %v1965_v18, %v6558_v7  ;;  %v1967_v52 = vpop.f32.mrb[70].mxu0  ;;  %v5109_v7 = vld [vmem:[#allocation3 + $0x110] ss:$8 sps:$4 sm:$0xff]  }
 0x375   :  { %v4550_v8 = vadd.f32 %v1967_v52, %v6559_v33  ;;  %v1969_v36 = vpop.f32.mrb[71].mxu0 }
 0x376   :  { %v2162_v9 = vmax.f32 %v4548_v32, %v4549_v40  ;;  %v4551_v10 = vadd.f32 %v1969_v36, %v6560_v47  ;;  %v6570_v40 = vld [vmem:[#allocation39_spill] sm:$0xff] }
 0x378   :  { %v2192_v25 = vmax.f32 %v2160_v16, %v2162_v9  ;;  %v2163_v54 = vmax.f32 %v4550_v8, %v4551_v10  ;;  %v5114_v8 = vld [vmem:[#allocation3 + $0x124] ss:$8 sps:$4 sm:$0xff]   ;;  %v6571_v9 = vld [vmem:[#allocation40_spill] sm:$0xff] }
 0x37a   :  { %v2223_v34 = vadd.f32 %v6096_v56, %v2192_v25  ;;  %v2193_v38 = vmax.f32 %v2161_v31, %v2163_v54  ;;  %v1973_v19 = vpop.f32.mrb[72].mxu0  ;;  %v6572_v25 = vld [vmem:[#allocation41_spill] sm:$0xff] }
 0x37b   :  { %v4552_v55 = vadd.f32 %v1973_v19, %v6561_v45  ;;  %v1975_v0 = vpop.f32.mrb[73].mxu0  ;;  %v5112_v19 = vld [vmem:[#allocation3 + $0x120] ss:$8 sps:$4 sm:$0xff]  }
 0x37c   :  { %v2224_v41 = vadd.f32 %v6096_v56, %v2193_v38  ;;  %v4553_v57 = vadd.f32 %v1975_v0, %v6562_v20  ;;  %v1977_v11 = vpop.f32.mrb[74].mxu0  ;;  %v2247_v50 = vmax.f32 %v2223_v34, 0.0  ;;  %v6573_v20 = vld [vmem:[#allocation42_spill] sm:$0xff] }
 0x37d   :  { %v4554_v1 = vadd.f32 %v1977_v11, %v6563_v21  ;;  %v1979_v22 = vpop.f32.mrb[75].mxu0  ;;  %v5115_v21 = vld [vmem:[#allocation3 + $0x130] ss:$8 sps:$4 sm:$0xff]  }
 0x37e   :  { %v2248_v2 = vmax.f32 %v2224_v41, 0.0  ;;  %v2164_v35 = vmax.f32 %v4552_v55, %v4553_v57  ;;  %v4555_v12 = vadd.f32 %v1979_v22, %v6564_v58  ;;  %v5117_v55 = vld [vmem:[#allocation3 + $0x134] ss:$8 sps:$4 sm:$0xff]  }
 0x380   :  { %v2165_v42 = vmax.f32 %v4554_v1, %v4555_v12  ;;  %v6214_v59 = vpack.c.bf16 %v2248_v2, %v2247_v50  ;;  %v6574_v1 = vld [vmem:[#allocation43_spill] sm:$0xff] }
 0x381   :  { %v5120_v2 = vld [vmem:[#allocation3 + $0x144] ss:$8 sps:$4 sm:$0xff]  }
 0x382   :  { %v1983_v13 = vpop.f32.mrb[76].mxu0  ;;  %2483 = vmatmul.mubr.bf16.gmra.mrb[124].mxu1 %v6214_v59 }
 0x383   :  { %v4556_v14 = vadd.f32 %v1983_v13, %v6565_v23  ;;  %v1985_v24 = vpop.f32.mrb[77].mxu0  ;;  %2605 = vmatprep.mubr.bf16.mxu1 %v6536_v26  ;;  %v6576_v13 = vld [vmem:[#allocation45_spill] sm:$0xff] }
 0x384   :  { %v4557_v28 = vadd.f32 %v1985_v24, %v6566_v3  ;;  %v1987_v4 = vpop.f32.mrb[78].mxu0  ;;  %v5123_v3 = vld [vmem:[#allocation3 + $0x154] ss:$8 sps:$4 sm:$0xff]  }
 0x385   :  { %v4558_v5 = vadd.f32 %v1987_v4, %v6567_v60  ;;  %v1989_v51 = vpop.f32.mrb[79].mxu0 }
 0x386   :  { %v2166_v49 = vmax.f32 %v4556_v14, %v4557_v28  ;;  %v4559_v61 = vadd.f32 %v1989_v51, %v6568_v39  ;;  %v5121_v39 = vld [vmem:[#allocation3 + $0x150] ss:$8 sps:$4 sm:$0xff]  }
 0x388   :  { %v2194_v6 = vmax.f32 %v2164_v35, %v2166_v49  ;;  %v2167_v16 = vmax.f32 %v4558_v5, %v4559_v61  ;;  %v6575_v35 = vld [vmem:[#allocation44_spill] sm:$0xff]  ;;  %v6577_v5 = vld [vmem:[#allocation46_spill] sm:$0xff]  ;;  %v6578_v61 = vld [vmem:[#allocation47_spill] sm:$0xff] }
 0x38a   :  { %v2195_v46 = vmax.f32 %v2165_v42, %v2167_v16  ;;  %v1993_v31 = vpop.f32.mrb[80].mxu0  ;;  %2606 = vmatmul.mubr.bf16.vlgmr.msra.gmra.mrb[96].mxu1 %v6104_v43  ;;  %v2225_v37 = vadd.f32 %v6096_v56, %v2194_v6  ;;  %v5126_v16 = vld [vmem:[#allocation3 + $0x164] ss:$8 sps:$4 sm:$0xff]  }
 0x38b   :  { %v4560_v32 = vadd.f32 %v1993_v31, %v6569_v17  ;;  %v1995_v18 = vpop.f32.mrb[81].mxu0  ;;  %2784 = vmatpush1.bf16.msra.mxu1 %v5106_v15  ;;  %2615 = vmatprep.mubr.bf16.mxu1 %v6536_v26 }
 0x38c   :  { %v4561_v52 = vadd.f32 %v1995_v18, %v6570_v40  ;;  %v1997_v33 = vpop.f32.mrb[82].mxu0  ;;  %2785 = vmatprep.subr.bf16.mxu1 %v5111_v30  ;;  %v2226_v36 = vadd.f32 %v6096_v56, %v2195_v46  ;;  %v2249_v34 = vmax.f32 %v2225_v37, 0.0  ;;  %v6579_v46 = vld [vmem:[#allocation48_spill] sm:$0xff] }
 0x38d   :  { %v4562_v47 = vadd.f32 %v1997_v33, %v6571_v9  ;;  %v1999_v10 = vpop.f32.mrb[83].mxu0 }
 0x38e   :  { %v2168_v43 = vmax.f32 %v4560_v32, %v4561_v52  ;;  %v4563_v54 = vadd.f32 %v1999_v10, %v6572_v25  ;;  %v2250_v38 = vmax.f32 %v2226_v36, 0.0  ;;  %v6580_v32 = vld [vmem:[#allocation49_spill] sm:$0xff]  ;;  %v5124_v52 = vld [vmem:[#allocation3 + $0x160] ss:$8 sps:$4 sm:$0xff]  }
 0x38f   :  { %2786 = vmatpush1.bf16.msra.mxu1 %v5109_v7  ;;  %v5127_v25 = vld [vmem:[#allocation3 + $0x170] ss:$8 sps:$4 sm:$0xff]  }
 0x390   :  { %v2169_v45 = vmax.f32 %v4562_v47, %v4563_v54  ;;  %2787 = vmatprep.subr.bf16.mxu1 %v5114_v8  ;;  %v6230_v0 = vpack.c.bf16 %v2250_v38, %v2249_v34  ;;  %v5129_v8 = vld [vmem:[#allocation3 + $0x174] ss:$8 sps:$4 sm:$0xff]   ;;  %v6581_v47 = vld [vmem:[#allocation50_spill] sm:$0xff]  ;;  %v6582_v54 = vld [vmem:[#allocation51_spill] sm:$0xff] }
 0x392   :  { %v2003_v41 = vpop.f32.mrb[84].mxu0  ;;  %2616 = vmatmul.mubr.bf16.gmra.mrb[100].mxu1 %v6116_v48  ;;  %v5118_v48 = vld [vmem:[#allocation3 + $0x140] ss:$8 sps:$4 sm:$0xff]  }
 0x393   :  { %v4564_v57 = vadd.f32 %v2003_v41, %v6573_v20  ;;  %v2005_v11 = vpop.f32.mrb[85].mxu0  ;;  %2625 = vmatprep.mubr.bf16.mxu1 %v6536_v26  ;;  %2788 = vmatpush1.bf16.msra.mxu1 %v5112_v19  ;;  %v5132_v19 = vld [vmem:[#allocation3 + $0x184] ss:$8 sps:$4 sm:$0xff]  }
 0x394   :  { %v4565_v22 = vadd.f32 %v2005_v11, %v6574_v1  ;;  %v2007_v50 = vpop.f32.mrb[86].mxu0  ;;  %2789 = vmatprep.subr.bf16.mxu1 %v5117_v55 }
 0x395   :  { %v4566_v58 = vadd.f32 %v2007_v50, %v6575_v35  ;;  %v2009_v12 = vpop.f32.mrb[87].mxu0 }
 0x396   :  { %v2170_v42 = vmax.f32 %v4564_v57, %v4565_v22  ;;  %v4567_v23 = vadd.f32 %v2009_v12, %v6576_v13  ;;  %v6584_v57 = vld [vmem:[#allocation53_spill] sm:$0xff] }
 0x397   :  { %2790 = vmatpush1.bf16.msra.mxu1 %v5115_v21  ;;  %v5135_v13 = vld [vmem:[#allocation3 + $0x194] ss:$8 sps:$4 sm:$0xff]  }
 0x398   :  { %v2196_v14 = vmax.f32 %v2168_v43, %v2170_v42  ;;  %v2171_v24 = vmax.f32 %v4566_v58, %v4567_v23  ;;  %2791 = vmatprep.subr.bf16.mxu1 %v5120_v2  ;;  %v5130_v42 = vld [vmem:[#allocation3 + $0x180] ss:$8 sps:$4 sm:$0xff]   ;;  %v5138_v23 = vld [vmem:[#allocation3 + $0x1a4] ss:$8 sps:$4 sm:$0xff]  }
 0x39a   :  { %v2197_v28 = vmax.f32 %v2169_v45, %v2171_v24  ;;  %v2013_v4 = vpop.f32.mrb[88].mxu0  ;;  %2626 = vmatmul.mubr.bf16.gmra.mrb[104].mxu1 %v6130_v44  ;;  %v2227_v60 = vadd.f32 %v6096_v56, %v2196_v14  ;;  %v6583_v45 = vld [vmem:[#allocation52_spill] sm:$0xff] }
 0x39b   :  { %v4568_v51 = vadd.f32 %v2013_v4, %v6577_v5  ;;  %v2015_v49 = vpop.f32.mrb[89].mxu0  ;;  %2635 = vmatprep.mubr.bf16.mxu1 %v6536_v26  ;;  %2792 = vmatpush1.bf16.msra.mxu1 %v5118_v48  ;;  %v5136_v48 = vld [vmem:[#allocation3 + $0x1a0] ss:$8 sps:$4 sm:$0xff]   ;;  %v5141_v14 = vld [vmem:[#allocation3 + $0x1b4] ss:$8 sps:$4 sm:$0xff]  }
 0x39c   :  { %v4569_v15 = vadd.f32 %v2015_v49, %v6578_v61  ;;  %v2017_v6 = vpop.f32.mrb[90].mxu0  ;;  %2793 = vmatprep.subr.bf16.mxu1 %v5123_v3  ;;  %v2228_v30 = vadd.f32 %v6096_v56, %v2197_v28  ;;  %v2251_v7 = vmax.f32 %v2227_v60, 0.0  ;;  %v5139_v24 = vld [vmem:[#allocation3 + $0x1b0] ss:$8 sps:$4 sm:$0xff]   ;;  %v5144_v3 = vld [vmem:[#allocation3 + $0x1c4] ss:$8 sps:$4 sm:$0xff]  }
 0x39d   :  { %v4570_v31 = vadd.f32 %v2017_v6, %v6579_v46  ;;  %v2019_v37 = vpop.f32.mrb[91].mxu0  ;;  %v5147_v28 = vld [vmem:[#allocation3 + $0x1d4] ss:$8 sps:$4 sm:$0xff]   ;;  %v5145_v4 = vld [vmem:[#allocation3 + $0x1d0] ss:$8 sps:$4 sm:$0xff]  }
 0x39e   :  { %v2172_v17 = vmax.f32 %v4568_v51, %v4569_v15  ;;  %v4571_v18 = vadd.f32 %v2019_v37, %v6580_v32  ;;  %v2252_v40 = vmax.f32 %v2228_v30, 0.0  ;;  %v5150_v60 = vld [vmem:[#allocation3 + $0x1e4] ss:$8 sps:$4 sm:$0xff]   ;;  %v5148_v5 = vld [vmem:[#allocation3 + $0x1e0] ss:$8 sps:$4 sm:$0xff]  }
 0x39f   :  { %2794 = vmatpush1.bf16.msra.mxu1 %v5121_v39  ;;  %v5153_v51 = vld [vmem:[#allocation3 + $0x1f4] ss:$8 sps:$4 sm:$0xff]   ;;  %v5151_v49 = vld [vmem:[#allocation3 + $0x1f0] ss:$8 sps:$4 sm:$0xff]   ;;  %v5156_v39 = vld [vmem:[#allocation3 + $0x204] ss:$8 sps:$4 sm:$0xff]  }
 0x3a0   :  { %v2173_v33 = vmax.f32 %v4570_v31, %v4571_v18  ;;  %2795 = vmatprep.subr.bf16.mxu1 %v5126_v16  ;;  %v6246_v36 = vpack.c.bf16 %v2252_v40, %v2251_v7  ;;  %v5154_v61 = vld [vmem:[#allocation3 + $0x200] ss:$8 sps:$4 sm:$0xff]   ;;  %v5159_v15 = vld [vmem:[#allocation3 + $0x214] ss:$8 sps:$4 sm:$0xff]   ;;  %v5157_v6 = vld [vmem:[#allocation3 + $0x210] ss:$8 sps:$4 sm:$0xff]  }
 0x3a1   :  { %v5162_v16 = vld [vmem:[#allocation3 + $0x224] ss:$8 sps:$4 sm:$0xff]   ;;  %v5160_v30 = vld [vmem:[#allocation3 + $0x220] ss:$8 sps:$4 sm:$0xff]   ;;  %v5165_v46 = vld [vmem:[#allocation3 + $0x234] ss:$8 sps:$4 sm:$0xff]  }
 0x3a2   :  { %v2023_v9 = vpop.f32.mrb[92].mxu0  ;;  %2636 = vmatmul.mubr.bf16.gmra.mrb[108].mxu1 %v6144_v27  ;;  %v5163_v31 = vld [vmem:[#allocation3 + $0x230] ss:$8 sps:$4 sm:$0xff]   ;;  %v5168_v37 = vld [vmem:[#allocation3 + $0x244] ss:$8 sps:$4 sm:$0xff]  }
 0x3a3   :  { %v4572_v10 = vadd.f32 %v2023_v9, %v6581_v47  ;;  %v2025_v43 = vpop.f32.mrb[93].mxu0  ;;  %2645 = vmatprep.mubr.bf16.mxu1 %v6536_v26  ;;  %2796 = vmatpush1.bf16.msra.mxu1 %v5124_v52  ;;  %v5169_v32 = vld [vmem:[#allocation3 + $0x250] ss:$8 sps:$4 sm:$0xff]   ;;  %v5174_v18 = vld [vmem:[#allocation3 + $0x264] ss:$8 sps:$4 sm:$0xff]  }
 0x3a4   :  { %v4573_v34 = vadd.f32 %v2025_v43, %v6582_v54  ;;  %v2027_v38 = vpop.f32.mrb[94].mxu0  ;;  %2797 = vmatprep.subr.bf16.mxu1 %v5129_v8  ;;  %v5172_v7 = vld [vmem:[#allocation3 + $0x260] ss:$8 sps:$4 sm:$0xff]   ;;  %v5177_v40 = vld [vmem:[#allocation3 + $0x274] ss:$8 sps:$4 sm:$0xff]  }
 0x3a5   :  { %v4574_v55 = vadd.f32 %v2027_v38, %v6583_v45  ;;  %v2029_v41 = vpop.f32.mrb[95].mxu0  ;;  %v5175_v52 = vld [vmem:[#allocation3 + $0x270] ss:$8 sps:$4 sm:$0xff]   ;;  %v5178_v8 = vld [vmem:[%s6481_s5 + $0x40] sm:$0xff]   ;;  %v5179_v9 = vld [vmem:[%s6481_s5 + $0x48] sm:$0xff]  }
 0x3a6   :  { %v2174_v20 = vmax.f32 %v4572_v10, %v4573_v34  ;;  %v4575_v11 = vadd.f32 %v2029_v41, %v6584_v57  ;;  %v5180_v47 = vld [vmem:[%s6481_s5 + $0x50] sm:$0xff]   ;;  %v6351_v45 = vld [vmem:[%s6480_s4] ss:$0 sm:$0xff] }
 0x3a7   :  { %2798 = vmatpush1.bf16.msra.mxu1 %v5127_v25 }
 0x3a8   :  { %v2198_v21 = vmax.f32 %v2172_v17, %v2174_v20  ;;  %v2175_v1 = vmax.f32 %v4574_v55, %v4575_v11  ;;  %3025 = vmatprep.subr.bf16.mxu1 %v5132_v19  ;;  %v5171_v17 = vld [vmem:[#allocation3 + $0x254] ss:$8 sps:$4 sm:$0xff]  }
 0x3aa   :  { %v2199_v22 = vmax.f32 %v2173_v33, %v2175_v1  ;;  %2646 = vmatmul.mubr.bf16.gmra.mrb[112].mxu1 %v6158_v62  ;;  %v2229_v50 = vadd.f32 %v6096_v56, %v2198_v21  ;;  %v5242_v33 = vmov 0.0  }
 0x3ab   :  { %2655 = vmatprep.mubr.bf16.mxu1 %v6536_v26 }
 0x3ac   :  { %v2230_v2 = vadd.f32 %v6096_v56, %v2199_v22  ;;  %v2253_v35 = vmax.f32 %v2229_v50, 0.0  ;;  %v5133_v56 = vld [vmem:[#allocation3 + $0x190] ss:$8 sps:$4 sm:$0xff]  }
 0x3ae   :  { %v2254_v58 = vmax.f32 %v2230_v2, 0.0 }
 0x3b0   :  { %v6258_v12 = vpack.c.bf16 %v2254_v58, %v2253_v35 }
 0x3b2   :  { %2656 = vmatmul.mubr.bf16.gmra.mrb[116].mxu1 %v6172_v29 }
 0x3b3   :  { %2665 = vmatprep.mubr.bf16.mxu1 %v6536_v26 }
 0x3ba   :  { %2666 = vmatmul.mubr.bf16.gmra.mrb[120].mxu1 %v6186_v63 }
 0x3bb   :  { %2675 = vmatprep.mubr.bf16.mxu1 %v6536_v26 }
 0x3c2   :  { %2676 = vmatmul.mubr.bf16.gmra.mrb[124].mxu1 %v6200_v53 }
 0x3c3   :  { %2815 = vmatprep.mubr.bf16.mxu1 %v6536_v26 }
 0x3ca   :  { %2816 = vmatmul.mubr.bf16.vlgmr.msra.gmra.mrb[96].mxu1 %v6130_v44  ;;  %v5142_v44 = vld [vmem:[#allocation3 + $0x1c0] ss:$8 sps:$4 sm:$0xff]  }
 0x3cb   :  { %3026 = vmatpush1.bf16.msra.mxu1 %v5130_v42  ;;  %2825 = vmatprep.mubr.bf16.mxu1 %v6536_v26 }
 0x3cc   :  { %3027 = vmatprep.subr.bf16.mxu1 %v5135_v13 }
 0x3cf   :  { %3028 = vmatpush1.bf16.msra.mxu1 %v5133_v56 }
 0x3d0   :  { %3029 = vmatprep.subr.bf16.mxu1 %v5138_v23 }
 0x3d2   :  { %2826 = vmatmul.mubr.bf16.gmra.mrb[100].mxu1 %v6144_v27 }
 0x3d3   :  { %2835 = vmatprep.mubr.bf16.mxu1 %v6536_v26  ;;  %3030 = vmatpush1.bf16.msra.mxu1 %v5136_v48 }
 0x3d4   :  { %3031 = vmatprep.subr.bf16.mxu1 %v5141_v14 }
 0x3d7   :  { %3032 = vmatpush1.bf16.msra.mxu1 %v5139_v24 }
 0x3d8   :  { %3033 = vmatprep.subr.bf16.mxu1 %v5144_v3 }
 0x3da   :  { %2836 = vmatmul.mubr.bf16.gmra.mrb[104].mxu1 %v6158_v62 }
 0x3db   :  { %2845 = vmatprep.mubr.bf16.mxu1 %v6536_v26  ;;  %3034 = vmatpush1.bf16.msra.mxu1 %v5142_v44 }
 0x3dc   :  { %3035 = vmatprep.subr.bf16.mxu1 %v5147_v28 }
 0x3df   :  { %3036 = vmatpush1.bf16.msra.mxu1 %v5145_v4 }
 0x3e0   :  { %3037 = vmatprep.subr.bf16.mxu1 %v5150_v60 }
 0x3e2   :  { %2846 = vmatmul.mubr.bf16.gmra.mrb[108].mxu1 %v6172_v29 }
 0x3e3   :  { %2855 = vmatprep.mubr.bf16.mxu1 %v6536_v26  ;;  %3038 = vmatpush1.bf16.msra.mxu1 %v5148_v5 }
 0x3e4   :  { %3039 = vmatprep.subr.bf16.mxu1 %v5153_v51 }
 0x3e7   :  { %3040 = vmatpush1.bf16.msra.mxu1 %v5151_v49 }
 0x3e8   :  { %3267 = vmatprep.subr.bf16.mxu1 %v5156_v39 }
 0x3ea   :  { %2856 = vmatmul.mubr.bf16.gmra.mrb[112].mxu1 %v6186_v63 }
 0x3eb   :  { %2865 = vmatprep.mubr.bf16.mxu1 %v6536_v26 }
 0x3f2   :  { %2866 = vmatmul.mubr.bf16.gmra.mrb[116].mxu1 %v6200_v53 }
 0x3f3   :  { %2875 = vmatprep.mubr.bf16.mxu1 %v6536_v26 }
 0x3fa   :  { %2876 = vmatmul.mubr.bf16.gmra.mrb[120].mxu1 %v6214_v59 }
 0x3fb   :  { %2885 = vmatprep.mubr.bf16.mxu1 %v6536_v26 }
 0x402   :  { %2886 = vmatmul.mubr.bf16.gmra.mrb[124].mxu1 %v6230_v0 }
 0x403   :  { %3057 = vmatprep.mubr.bf16.mxu1 %v6536_v26 }
 0x40a   :  { %3058 = vmatmul.mubr.bf16.vlgmr.msra.gmra.mrb[96].mxu1 %v6144_v27  ;;  %v5166_v27 = vld [vmem:[#allocation3 + $0x240] ss:$8 sps:$4 sm:$0xff]  }
 0x40b   :  { %3268 = vmatpush1.bf16.msra.mxu1 %v5154_v61  ;;  %3067 = vmatprep.mubr.bf16.mxu1 %v6536_v26 }
 0x40c   :  { %3269 = vmatprep.subr.bf16.mxu1 %v5159_v15 }
 0x40f   :  { %3270 = vmatpush1.bf16.msra.mxu1 %v5157_v6 }
 0x410   :  { %3271 = vmatprep.subr.bf16.mxu1 %v5162_v16  ;;  %v5186_v16 = vld [vmem:[%s6481_s5] sm:$0xff]  }
 0x412   :  { %3068 = vmatmul.mubr.bf16.gmra.mrb[100].mxu1 %v6158_v62 }
 0x413   :  { %3077 = vmatprep.mubr.bf16.mxu1 %v6536_v26  ;;  %3272 = vmatpush1.bf16.msra.mxu1 %v5160_v30 }
 0x414   :  { %3273 = vmatprep.subr.bf16.mxu1 %v5165_v46 }
 0x417   :  { %3274 = vmatpush1.bf16.msra.mxu1 %v5163_v31  ;;  %v5187_v31 = vld [vmem:[%s6481_s5 + $0x8] sm:$0xff]  }
 0x418   :  { %3275 = vmatprep.subr.bf16.mxu1 %v5168_v37 }
 0x41a   :  { %3078 = vmatmul.mubr.bf16.gmra.mrb[104].mxu1 %v6172_v29 }
 0x41b   :  { %3087 = vmatprep.mubr.bf16.mxu1 %v6536_v26  ;;  %3276 = vmatpush1.bf16.msra.mxu1 %v5166_v27 }
 0x41c   :  { %3277 = vmatprep.subr.bf16.mxu1 %v5171_v17 }
 0x41f   :  { %3278 = vmatpush1.bf16.msra.mxu1 %v5169_v32 }
 0x420   :  { %3279 = vmatprep.subr.bf16.mxu1 %v5174_v18 }
 0x422   :  { %3088 = vmatmul.mubr.bf16.gmra.mrb[108].mxu1 %v6186_v63 }
 0x423   :  { %3097 = vmatprep.mubr.bf16.mxu1 %v6536_v26  ;;  %3280 = vmatpush1.bf16.msra.mxu1 %v5172_v7  ;;  %v5188_v7 = vld [vmem:[%s6481_s5 + $0x10] sm:$0xff]  }
 0x424   :  { %3281 = vmatprep.subr.bf16.mxu1 %v5177_v40 }
 0x427   :  { %3282 = vmatpush1.bf16.msra.mxu1 %v5175_v52 }
 0x428   :  { %4386 = vmatprep.subr.bf16.mxu1 %v5242_v33 }
 0x42a   :  { %3098 = vmatmul.mubr.bf16.gmra.mrb[112].mxu1 %v6200_v53 }
 0x42b   :  { %3107 = vmatprep.mubr.bf16.mxu1 %v6536_v26 }
 0x432   :  { %3108 = vmatmul.mubr.bf16.gmra.mrb[116].mxu1 %v6214_v59 }
 0x433   :  { %3117 = vmatprep.mubr.bf16.mxu1 %v6536_v26 }
 0x43a   :  { %3118 = vmatmul.mubr.bf16.gmra.mrb[120].mxu1 %v6230_v0 }
 0x43b   :  { %3127 = vmatprep.mubr.bf16.mxu1 %v6536_v26 }
 0x442   :  { %3128 = vmatmul.mubr.bf16.gmra.mrb[124].mxu1 %v6246_v36 }
 0x443   :  { %3299 = vmatprep.mubr.bf16.mxu1 %v6536_v26 }
 0x44a   :  { %3300 = vmatmul.mubr.bf16.vlgmr.msra.gmra.mrb[96].mxu1 %v6158_v62  ;;  %v5181_v62 = vld [vmem:[%s6481_s5 + $0x58] sm:$0xff]  }
 0x44b   :  { %3309 = vmatprep.mubr.bf16.mxu1 %v6536_v26  ;;  %4387 = vmatpush3.bf16.msra.mxu1 %v5178_v8 }
 0x44c   :  { %4388 = vmatprep.subr.bf16.mxu1 %v5242_v33 }
 0x44f   :  { %4389 = vmatpush3.bf16.msra.mxu1 %v5179_v9 }
 0x450   :  { %4390 = vmatprep.subr.bf16.mxu1 %v5242_v33 }
 0x452   :  { %3310 = vmatmul.mubr.bf16.gmra.mrb[100].mxu1 %v6172_v29  ;;  %v5182_v29 = vld [vmem:[%s6481_s5 + $0x60] sm:$0xff]  }
 0x453   :  { %3319 = vmatprep.mubr.bf16.mxu1 %v6536_v26  ;;  %4391 = vmatpush3.bf16.msra.mxu1 %v5180_v47  ;;  %v5189_v47 = vld [vmem:[%s6481_s5 + $0x18] sm:$0xff]  }
 0x454   :  { %4392 = vmatprep.subr.bf16.mxu1 %v5242_v33 }
 0x457   :  { %4393 = vmatpush3.bf16.msra.mxu1 %v5181_v62 }
 0x458   :  { %4394 = vmatprep.subr.bf16.mxu1 %v5242_v33 }
 0x45a   :  { %3320 = vmatmul.mubr.bf16.gmra.mrb[104].mxu1 %v6186_v63  ;;  %v5183_v63 = vld [vmem:[%s6481_s5 + $0x68] sm:$0xff]  }
 0x45b   :  { %3329 = vmatprep.mubr.bf16.mxu1 %v6536_v26  ;;  %4395 = vmatpush3.bf16.msra.mxu1 %v5182_v29 }
 0x45c   :  { %4396 = vmatprep.subr.bf16.mxu1 %v5242_v33 }
 0x45f   :  { %4397 = vmatpush3.bf16.msra.mxu1 %v5183_v63 }
 0x460   :  { %4398 = vmatprep.subr.bf16.mxu1 %v5242_v33 }
 0x462   :  { %3330 = vmatmul.mubr.bf16.gmra.mrb[108].mxu1 %v6200_v53  ;;  %v5184_v53 = vld [vmem:[%s6481_s5 + $0x70] sm:$0xff]  }
 0x463   :  { %3339 = vmatprep.mubr.bf16.mxu1 %v6536_v26  ;;  %4399 = vmatpush3.bf16.msra.mxu1 %v5184_v53 }
 0x464   :  { %4400 = vmatprep.subr.bf16.mxu1 %v5242_v33 }
 0x46a   :  { %3340 = vmatmul.mubr.bf16.gmra.mrb[112].mxu1 %v6214_v59 }
 0x46b   :  { %3349 = vmatprep.mubr.bf16.mxu1 %v6536_v26 }
 0x472   :  { %3350 = vmatmul.mubr.bf16.gmra.mrb[116].mxu1 %v6230_v0 }
 0x473   :  { %3359 = vmatprep.mubr.bf16.mxu1 %v6536_v26 }
 0x47a   :  { %3360 = vmatmul.mubr.bf16.gmra.mrb[120].mxu1 %v6246_v36 }
 0x47b   :  { %3369 = vmatprep.mubr.bf16.mxu1 %v6536_v26  ;;  %v5185_v26 = vld [vmem:[%s6481_s5 + $0x78] sm:$0xff]  }
 0x47c   :  { %4401 = vmatpush3.bf16.msra.mxu1 %v5185_v26 }
 0x47d   :  { %4406 = vmatprep.subr.bf16.mxu1 %v5242_v33 }
 0x482   :  { %3370 = vmatmul.mubr.bf16.gmra.mrb[124].mxu1 %v6258_v12 }
 0x483   :  { %4402 = vmatprep.mubr.msk.bf16.mxu1 %vm5243_vm2, %v5242_v33 }
 0x51d   :  { %v3301_v59 = vpop.f32.mrb[96].mxu1 }
 0x51e   :  { %v3303_v0 = vpop.f32.mrb[97].mxu1 }
 0x51f   :  { %v3412_v36 = vmax.f32 %v3301_v59, %v3303_v0  ;;  %v3305_v10 = vpop.f32.mrb[98].mxu1 }
 0x520   :  { %v3307_v43 = vpop.f32.mrb[99].mxu1 }
 0x521   :  { %v3413_v25 = vmax.f32 %v3305_v10, %v3307_v43  ;;  %v5190_v10 = vld [vmem:[%s6481_s5 + $0x20] sm:$0xff]  }
 0x525   :  { %v3311_v54 = vpop.f32.mrb[100].mxu1 }
 0x526   :  { %v3313_v34 = vpop.f32.mrb[101].mxu1 }
 0x527   :  { %v3414_v38 = vmax.f32 %v3311_v54, %v3313_v34  ;;  %v3315_v19 = vpop.f32.mrb[102].mxu1  ;;  %v5191_v54 = vld [vmem:[%s6481_s5 + $0x28] sm:$0xff]  }
 0x528   :  { %v3317_v55 = vpop.f32.mrb[103].mxu1 }
 0x529   :  { %v3428_v41 = vmax.f32 %v3412_v36, %v3414_v38  ;;  %v3415_v20 = vmax.f32 %v3315_v19, %v3317_v55 }
 0x52b   :  { %v3443_v57 = vadd.f32 %v6351_v45, %v3428_v41  ;;  %v3429_v11 = vmax.f32 %v3413_v25, %v3415_v20  ;;  %v5192_v20 = vld [vmem:[%s6481_s5 + $0x30] sm:$0xff]  }
 0x52d   :  { %v3444_v21 = vadd.f32 %v6351_v45, %v3429_v11  ;;  %v3321_v1 = vpop.f32.mrb[104].mxu1  ;;  %v3451_v50 = vmax.f32 %v3443_v57, 0.0 }
 0x52e   :  { %v3323_v22 = vpop.f32.mrb[105].mxu1 }
 0x52f   :  { %v3452_v2 = vmax.f32 %v3444_v21, 0.0  ;;  %v3416_v35 = vmax.f32 %v3321_v1, %v3323_v22  ;;  %v3325_v58 = vpop.f32.mrb[106].mxu1  ;;  %v5193_v22 = vld [vmem:[%s6481_s5 + $0x38] sm:$0xff]  }
 0x530   :  { %v3327_v12 = vpop.f32.mrb[107].mxu1 }
 0x531   :  { %v6355_v42 = vpack.c.bf16 %v3452_v2, %v3451_v50  ;;  %v3417_v13 = vmax.f32 %v3325_v58, %v3327_v12  ;;  %v5194_v58 = vld [vmem:[%s6481_s5 + $0x80] sm:$0xff]  }
 0x535   :  { %v3331_v56 = vpop.f32.mrb[108].mxu1 }
 0x536   :  { %v3333_v23 = vpop.f32.mrb[109].mxu1 }
 0x537   :  { %v3418_v48 = vmax.f32 %v3331_v56, %v3333_v23  ;;  %v3335_v14 = vpop.f32.mrb[110].mxu1  ;;  %v5198_v56 = vld [vmem:[%s6481_s5 + $0xa0] sm:$0xff]   ;;  %v5199_v23 = vld [vmem:[%s6481_s5 + $0xa8] sm:$0xff]  }
 0x538   :  { %v3337_v24 = vpop.f32.mrb[111].mxu1 }
 0x539   :  { %v3430_v3 = vmax.f32 %v3416_v35, %v3418_v48  ;;  %v3419_v44 = vmax.f32 %v3335_v14, %v3337_v24  ;;  %v5200_v48 = vld [vmem:[%s6481_s5 + $0xb0] sm:$0xff]   ;;  %v5201_v14 = vld [vmem:[%s6481_s5 + $0xb8] sm:$0xff]   ;;  %v5202_v24 = vld [vmem:[%s6481_s5 + $0xc0] sm:$0xff]  }
 0x53b   :  { %v3445_v28 = vadd.f32 %v6351_v45, %v3430_v3  ;;  %v3431_v4 = vmax.f32 %v3417_v13, %v3419_v44  ;;  %v5195_v13 = vld [vmem:[%s6481_s5 + $0x88] sm:$0xff]   ;;  %v5204_v44 = vld [vmem:[%s6481_s5 + $0xd0] sm:$0xff]  }
 0x53c   :  { %v5203_v3 = vld [vmem:[%s6481_s5 + $0xc8] sm:$0xff]  }
 0x53d   :  { %v3446_v60 = vadd.f32 %v6351_v45, %v3431_v4  ;;  %v3341_v5 = vpop.f32.mrb[112].mxu1  ;;  %v3453_v49 = vmax.f32 %v3445_v28, 0.0  ;;  %v5205_v28 = vld [vmem:[%s6481_s5 + $0xd8] sm:$0xff]   ;;  %v5206_v4 = vld [vmem:[%s6481_s5 + $0xe0] sm:$0xff]  }
 0x53e   :  { %v3343_v51 = vpop.f32.mrb[113].mxu1 }
 0x53f   :  { %v3454_v39 = vmax.f32 %v3446_v60, 0.0  ;;  %v3420_v61 = vmax.f32 %v3341_v5, %v3343_v51  ;;  %v3345_v15 = vpop.f32.mrb[114].mxu1  ;;  %v5207_v60 = vld [vmem:[%s6481_s5 + $0xe8] sm:$0xff]   ;;  %v5208_v5 = vld [vmem:[%s6481_s5 + $0xf0] sm:$0xff]   ;;  %v5209_v51 = vld [vmem:[%s6481_s5 + $0xf8] sm:$0xff]  }
 0x540   :  { %v3347_v6 = vpop.f32.mrb[115].mxu1 }
 0x541   :  { %v3460_v30 = vpack.c.bf16 %v3454_v39, %v3453_v49  ;;  %v3421_v46 = vmax.f32 %v3345_v15, %v3347_v6  ;;  %v5244_v49 = vmov 0.0|0.0   ;;  %v3902_v39 = vld [vmem:[#allocation2] sm:$0x1] }
 0x542   :  { %3905 = vperm.xlu0 %4999, %v3902_v39  }
 0x543   :  { %4403 = vmatmul.mubr.bf16.vlgmr.msra.gmra.mrb[128].mxu1 %v3460_v30 }
 0x544   :  { %4407 = vmatpush3.bf16.msra.mxu1 %v5186_v16  ;;  %4422 = vmatprep.mubr.msk.bf16.mxu1 %vm5243_vm2, %v5242_v33 }
 0x545   :  { %v3351_v37 = vpop.f32.mrb[116].mxu1  ;;  %4408 = vmatprep.subr.bf16.mxu1 %v5242_v33 }
 0x546   :  { %v3353_v27 = vpop.f32.mrb[117].mxu1 }
 0x547   :  { %v3422_v17 = vmax.f32 %v3351_v37, %v3353_v27  ;;  %v3355_v32 = vpop.f32.mrb[118].mxu1 }
 0x548   :  { %4409 = vmatpush3.bf16.msra.mxu1 %v5187_v31  ;;  %v3357_v18 = vpop.f32.mrb[119].mxu1 }
 0x549   :  { %v3432_v40 = vmax.f32 %v3420_v61, %v3422_v17  ;;  %v3423_v52 = vmax.f32 %v3355_v32, %v3357_v18  ;;  %4410 = vmatprep.subr.bf16.mxu1 %v5242_v33 }
 0x54b   :  { %v3447_v8 = vadd.f32 %v6351_v45, %v3432_v40  ;;  %v3433_v9 = vmax.f32 %v3421_v46, %v3423_v52 }
 0x54c   :  { %4411 = vmatpush3.bf16.msra.mxu1 %v5188_v7 }
 0x54d   :  { %v3448_v62 = vadd.f32 %v6351_v45, %v3433_v9  ;;  %v3361_v29 = vpop.f32.mrb[120].mxu1  ;;  %4412 = vmatprep.subr.bf16.mxu1 %v5242_v33  ;;  %v3455_v53 = vmax.f32 %v3447_v8, 0.0  ;;  %v4346_v9 = vld [vmem:[%s6482_s6] ss:$0 sm:$0xff] }
 0x54e   :  { %v3363_v63 = vpop.f32.mrb[121].mxu1 }
 0x54f   :  { %v3456_v26 = vmax.f32 %v3448_v62, 0.0  ;;  %v3424_v59 = vmax.f32 %v3361_v29, %v3363_v63  ;;  %v3365_v0 = vpop.f32.mrb[122].mxu1 }
 0x550   :  { %4413 = vmatpush3.bf16.msra.mxu1 %v5189_v47  ;;  %v3367_v36 = vpop.f32.mrb[123].mxu1 }
 0x551   :  { %v3461_v43 = vpack.c.bf16 %v3456_v26, %v3455_v53  ;;  %v3425_v25 = vmax.f32 %v3365_v0, %v3367_v36  ;;  %4414 = vmatprep.subr.bf16.mxu1 %v5242_v33 }
 0x554   :  { %4415 = vmatpush3.bf16.msra.mxu1 %v5190_v10 }
 0x555   :  { %v3371_v34 = vpop.f32.mrb[124].mxu1  ;;  %4416 = vmatprep.subr.bf16.mxu1 %v5242_v33 }
 0x556   :  { %v3373_v38 = vpop.f32.mrb[125].mxu1 }
 0x557   :  { %v3426_v19 = vmax.f32 %v3371_v34, %v3373_v38  ;;  %v3375_v55 = vpop.f32.mrb[126].mxu1 }
 0x558   :  { %4417 = vmatpush3.bf16.msra.mxu1 %v5191_v54  ;;  %v3377_v41 = vpop.f32.mrb[127].mxu1 }
 0x559   :  { %v3434_v57 = vmax.f32 %v3424_v59, %v3426_v19  ;;  %v3427_v11 = vmax.f32 %v3375_v55, %v3377_v41  ;;  %4418 = vmatprep.subr.bf16.mxu1 %v5242_v33 }
 0x55b   :  { %v3449_v21 = vadd.f32 %v6351_v45, %v3434_v57  ;;  %v3435_v1 = vmax.f32 %v3425_v25, %v3427_v11  ;;  %v3908_v25 = vlaneseq }
 0x55c   :  { %4419 = vmatpush3.bf16.msra.mxu1 %v5192_v20 }
 0x55d   :  { %v3450_v50 = vadd.f32 %v6351_v45, %v3435_v1  ;;  %4420 = vmatprep.subr.bf16.mxu1 %v5242_v33  ;;  %v3457_v2 = vmax.f32 %v3449_v21, 0.0  ;;  %v5196_v45 = vld [vmem:[%s6481_s5 + $0x90] sm:$0xff]   ;;  %v3909_v54 = vshrl.u32 %v3908_v25, 7 }
 0x55f   :  { %v3458_v35 = vmax.f32 %v3450_v50, 0.0  ;;  %v3910_v34 = vsub.s32 0, %v3909_v54 }
 0x560   :  { %4421 = vmatpush3.bf16.msra.mxu1 %v5193_v22 }
 0x561   :  { %v3462_v12 = vpack.c.bf16 %v3458_v35, %v3457_v2  ;;  %4426 = vmatprep.subr.bf16.mxu1 %v5242_v33 }
 0x563   :  { %4423 = vmatmul.mubr.bf16.vlgmr.msra.gmra.mrb[132].mxu1 %v6355_v42  ;;  %v5197_v42 = vld [vmem:[%s6481_s5 + $0x98] sm:$0xff]  }
 0x564   :  { %4427 = vmatpush3.bf16.msra.mxu1 %v5194_v58  ;;  %4442 = vmatprep.mubr.msk.bf16.mxu1 %vm5243_vm2, %v5242_v33 }
 0x565   :  { %4428 = vmatprep.subr.bf16.mxu1 %v5242_v33 }
 0x568   :  { %4429 = vmatpush3.bf16.msra.mxu1 %v5195_v13 }
 0x569   :  { %4430 = vmatprep.subr.bf16.mxu1 %v5242_v33 }
 0x56c   :  { %4431 = vmatpush3.bf16.msra.mxu1 %v5196_v45 }
 0x56d   :  { %4432 = vmatprep.subr.bf16.mxu1 %v5242_v33 }
 0x570   :  { %4433 = vmatpush3.bf16.msra.mxu1 %v5197_v42 }
 0x571   :  { %4434 = vmatprep.subr.bf16.mxu1 %v5242_v33 }
 0x574   :  { %4435 = vmatpush3.bf16.msra.mxu1 %v5198_v56 }
 0x575   :  { %4436 = vmatprep.subr.bf16.mxu1 %v5242_v33 }
 0x578   :  { %4437 = vmatpush3.bf16.msra.mxu1 %v5199_v23 }
 0x579   :  { %4438 = vmatprep.subr.bf16.mxu1 %v5242_v33 }
 0x57c   :  { %4439 = vmatpush3.bf16.msra.mxu1 %v5200_v48 }
 0x57d   :  { %4440 = vmatprep.subr.bf16.mxu1 %v5242_v33 }
 0x580   :  { %4441 = vmatpush3.bf16.msra.mxu1 %v5201_v14 }
 0x581   :  { %4446 = vmatprep.subr.bf16.mxu1 %v5242_v33 }
 0x583   :  { %4443 = vmatmul.mubr.bf16.vlgmr.msra.gmra.mrb[136].mxu1 %v3461_v43  ;;  %v3901_v43 = vld [vmem:[%s6483_s7] sm:$0x1] }
 0x584   :  { %4447 = vmatpush3.bf16.msra.mxu1 %v5202_v24  ;;  %4462 = vmatprep.mubr.msk.bf16.mxu1 %vm5243_vm2, %v5242_v33 }
 0x585   :  { %4448 = vmatprep.subr.bf16.mxu1 %v5242_v33 }
 0x588   :  { %4449 = vmatpush3.bf16.msra.mxu1 %v5203_v3 }
 0x589   :  { %4450 = vmatprep.subr.bf16.mxu1 %v5242_v33 }
 0x58c   :  { %4451 = vmatpush3.bf16.msra.mxu1 %v5204_v44 }
 0x58d   :  { %4452 = vmatprep.subr.bf16.mxu1 %v5242_v33 }
 0x590   :  { %4453 = vmatpush3.bf16.msra.mxu1 %v5205_v28 }
 0x591   :  { %4454 = vmatprep.subr.bf16.mxu1 %v5242_v33 }
 0x594   :  { %4455 = vmatpush3.bf16.msra.mxu1 %v5206_v4 }
 0x595   :  { %4456 = vmatprep.subr.bf16.mxu1 %v5242_v33 }
 0x598   :  { %4457 = vmatpush3.bf16.msra.mxu1 %v5207_v60 }
 0x599   :  { %4458 = vmatprep.subr.bf16.mxu1 %v5242_v33 }
 0x59c   :  { %4459 = vmatpush3.bf16.msra.mxu1 %v5208_v5 }
 0x59d   :  { %4460 = vmatprep.subr.bf16.mxu1 %v5242_v33 }
 0x5a0   :  { %4461 = vmatpush3.bf16.msra.mxu1 %v5209_v51 }
 0x5a1   :  { %4473 = vmatprep.subr.bf16.mxu1 %v5244_v49 }
 0x5a3   :  { %4463 = vmatmul.mubr.bf16.vlgmr.msra.gmra.mrb[140].mxu1 %v3462_v12 }
 0x5a4   :  { %4470 = vmatprep.mubr.msk.f32.mxu1 %vm5243_vm2, %v5242_v33 }
 0x5c1   :  { %v3906_v38 = vpop.permute.xlu0 %3905 }
 0x5c2   :  { %v3911_v19 = vrot.slane %v3906_v38, %v3910_v34 }
 0x616   :  { %v3578_v61 = vpop.f32.mrb[128].mxu1 }
 0x617   :  { %v4404_v15 = vpop.f32.mrb[129].mxu1 }
 0x618   :  { %v3581_v6 = vpop.f32.mrb[130].mxu1 }
 0x619   :  { %v4405_v16 = vpop.f32.mrb[131].mxu1 }
 0x636   :  { %v3667_v30 = vpop.f32.mrb[132].mxu1 }
 0x637   :  { %v3668_v46 = vadd.f32 %v3667_v30, %v3578_v61  ;;  %v4424_v31 = vpop.f32.mrb[133].mxu1 }
 0x638   :  { %v3670_v37 = vpop.f32.mrb[134].mxu1 }
 0x639   :  { %v3671_v27 = vadd.f32 %v3670_v37, %v3581_v6  ;;  %v4425_v17 = vpop.f32.mrb[135].mxu1 }
 0x656   :  { %v3773_v32 = vpop.f32.mrb[136].mxu1 }
 0x657   :  { %v3780_v18 = vadd.f32 %v3773_v32, %v3668_v46  ;;  %v4444_v7 = vpop.f32.mrb[137].mxu1 }
 0x658   :  { %v3776_v40 = vpop.f32.mrb[138].mxu1 }
 0x659   :  { %v3781_v52 = vadd.f32 %v3776_v40, %v3671_v27  ;;  %v4445_v33 = vpop.f32.mrb[139].mxu1 }
 0x676   :  { %v3881_v8 = vpop.f32.mrb[140].mxu1 }
 0x677   :  { %v3888_v47 = vadd.f32 %v3881_v8, %v3780_v18  ;;  %v4464_v62 = vpop.f32.mrb[141].mxu1 }
 0x678   :  { %v3884_v29 = vpop.f32.mrb[142].mxu1 }
 0x679   :  { %v3897_v63 = vadd.f32 %v4346_v9, %v3888_v47  ;;  %v3889_v53 = vadd.f32 %v3884_v29, %v3781_v52  ;;  %v4465_v26 = vpop.f32.mrb[143].mxu1 }
 0x67b   :  { %v3898_v59 = vadd.f32 %v4346_v9, %v3889_v53  ;;  %v3899_v0 = vmax.f32 %v3897_v63, 0.0 }
 0x67d   :  { %v3900_v36 = vmax.f32 %v3898_v59, 0.0 }
 0x67f   :  { %v4474_v10 = vpack.c.bf16 %v3900_v36, %v3899_v0 }
 0x681   :  { %4475 = vmatpush3.bf16.xpose.msra.mxu1 %v4474_v10 }
 0x688   :  { %4471 = vmatmul.mubr.f32.vlgmr.msra.gmra.mrb[144].mxu1 %v3901_v43 }
 0x75b   :  { %v3978_v55 = vpop.f32.mrb[144].mxu1 }
 0x75c   :  { %v3979_v41 = vadd.f32 %v3978_v55, %v3911_v19  ;;  %v4472_v20 = vpop.f32.mrb[145].mxu1 }
 0x75e   :  { %v3982_v57 = vsub.f32 0.0, %v3979_v41 }
 0x760   :  { %v3983_v11 = vmul.f32 1.442695, %v3982_v57 }
 0x762   :  { %5210 = vpow2.f32 %v3983_v11 }
 0x76c   :  { %v5211_v21 = vpop.eup %5210 }
 0x76d   :  { %v3985_v1 = vadd.f32 1.0, %v5211_v21 }
 0x76f   :  { %5212 = vrcp.f32 %v3985_v1 }
 0x779   :  { %v5213_v22 = vpop.eup %5212 }
 0x77a   :  { %3989 = vst.msk [vmem:[%s6485_s9] sm:$0x1] %vm3988_vm3, %v5213_v22 }
 0x77b   :  { %3994 = vsyncpa [#allocation4], 1 }

</bundles_post_ra>
